<compile_context>
chip_gen: v7x
topology: tpu7x:2x2x1
jax: 0.10.0
libtpu: 0.0.40
codegen_flags: <defaults>
</compile_context>

<pallas_src>
import functools

import jax
import jax.numpy as jnp
import numpy as np
from jax.experimental import pallas as pl
from jax.experimental.pallas import tpu as pltpu


# -----------------------------------------------------------------------------
# Pallas kernel
# -----------------------------------------------------------------------------
def conv_egnn2_kernel(aux_ref, h_ref, hn_ref,
                      wself_ref, wdist_ref, wbd_ref, wred_ref, wnode_ref,
                      bbig_ref, bsmall_ref, out_ref):
    f32, bf16 = jnp.float32, jnp.bfloat16

    h = h_ref[...]                                   # (TM, H)    f32
    hn16 = hn_ref[...]                               # (TM, K*H)  bf16, lane-dense
    aux = aux_ref[...]                               # (TM, 6+3K) f32: [ped(6), dx(K), dy(K), mask(K)]

    TM, H = h.shape
    KH = hn16.shape[1]
    K = KH // H

    x = aux[:, 0:2]
    v = aux[:, 2:4]
    acc = aux[:, 4:6]
    dx = aux[:, 6:6 + K]
    dy = aux[:, 6 + K:6 + 2 * K]
    mask = aux[:, 6 + 2 * K:6 + 3 * K]

    # ---- packed weights (static lane slices) --------------------------------
    w_self = wself_ref[...]                          # (H, KH)   we1[:H] tiled over K blocks
    w_dist = wdist_ref[...]                          # (K, KH)   we1[2H] block-diag rows
    w_e1n = wbd_ref[:, 0:KH]                         # (KH, KH)  blockdiag(we1[H:2H])
    w_e2 = wbd_ref[:, KH:2 * KH]                     # (KH, KH)  blockdiag(we2)
    w_x1 = wbd_ref[:, 2 * KH:3 * KH]                 # (KH, KH)  blockdiag(wx1)
    w_h1m = wred_ref[:, 0:H]                         # (KH, H)   wh1[H:2H] row-stacked (fused m_i sum)
    w_x2 = wred_ref[:, H:H + K]                      # (KH, K)   wx2 as K block columns
    w_a1 = wnode_ref[:, 0:H]                         # (H, H)
    w_h1h = wnode_ref[:, H:2 * H]                    # (H, H)
    w_h2 = wnode_ref[:, 2 * H:3 * H]                 # (H, H)
    b_e1 = bbig_ref[:, 0:KH]
    b_e2 = bbig_ref[:, KH:2 * KH]
    b_x1 = bbig_ref[:, 2 * KH:3 * KH]
    b_x2 = bbig_ref[:, 3 * KH:3 * KH + K]
    b_a1 = bsmall_ref[:, 0:H]
    b_h1 = bsmall_ref[:, H:2 * H]
    b_h2 = bsmall_ref[:, 2 * H:3 * H]
    w_a2_row = bsmall_ref[:, 3 * H:4 * H]            # (1, H)  f_a head as a row vector
    b_a2 = bsmall_ref[:, 4 * H:4 * H + 1]            # (1, 1)

    dot = lambda a, b: jnp.dot(a, b, preferred_element_type=f32)
    h16 = h.astype(bf16)

    # ---- f_e, batched over all K neighbors along the lane axis --------------
    dist = jnp.sqrt(dx * dx + dy * dy)                                   # (TM, K)
    t = (dot(h16, w_self) + dot(hn16, w_e1n)
         + dot(dist.astype(bf16), w_dist) + b_e1)                        # (TM, K*H)
    t = jax.nn.silu(t)
    m = jax.nn.silu(dot(t.astype(bf16), w_e2) + b_e2)                    # (TM, K*H) == m_ij
    m16 = m.astype(bf16)

    # ---- f_x and masked neighbor aggregation --------------------------------
    g = jax.nn.silu(dot(m16, w_x1) + b_x1)                               # (TM, K*H)
    fx = dot(g.astype(bf16), w_x2) + b_x2                                # (TM, K)
    wk = fx * mask                                                       # mask only gates agg
    neigh_num = jnp.sum(mask, axis=1, keepdims=True)                     # (TM, 1)
    inv = pl.reciprocal(neigh_num + 1e-6, approx=True)
    agg_x = jnp.sum(dx * wk, axis=1, keepdims=True) * inv
    agg_y = jnp.sum(dy * wk, axis=1, keepdims=True) * inv

    # ---- f_a and the kinematic update ----------------------------------------
    fa_h = jax.nn.silu(dot(h16, w_a1) + b_a1)                            # (TM, H)
    fa = jnp.sum(fa_h * w_a2_row, axis=1, keepdims=True) + b_a2          # (TM, 1)
    a_new = fa * acc + jnp.concatenate([agg_x, agg_y], axis=1)
    v_new = v + a_new
    x_new = x + v_new

    # ---- f_h with the (unmasked, as in torch) message sum fused into the matmul
    u = jax.nn.silu(dot(h16, w_h1h) + dot(m16, w_h1m) + b_h1)            # (TM, H)
    h_new = h + dot(u.astype(bf16), w_h2) + b_h2

    out_ref[...] = jnp.concatenate([x_new, v_new, a_new, h_new], axis=1)  # (TM, 6+H)


# -----------------------------------------------------------------------------
# Parameter packing (wrapper-side, cheap; done once per call)
# -----------------------------------------------------------------------------
def pack_params(p, K):
    """Expand / pack the 8 nn.Linear layers into 7 kernel-friendly arrays."""
    f32, bf16 = jnp.float32, jnp.bfloat16
    H = p["we2"].shape[0]
    eye_k = jnp.eye(K, dtype=f32)

    we1 = p["we1"]                                   # (2H+1, H): rows [h | h_neigh | dist]
    we1_h, we1_n, we1_d = we1[:H], we1[H:2 * H], we1[2 * H:2 * H + 1]
    wh1 = p["wh1"]                                   # (2H, H):   rows [h | m_i]
    wh1_h, wh1_m = wh1[:H], wh1[H:]

    w_self = jnp.tile(we1_h, (1, K)).astype(bf16)                         # (H, K*H)
    w_dist = jnp.kron(eye_k, we1_d).astype(bf16)                          # (K, K*H)
    w_bd = jnp.concatenate([jnp.kron(eye_k, we1_n),
                            jnp.kron(eye_k, p["we2"]),
                            jnp.kron(eye_k, p["wx1"])], axis=1).astype(bf16)   # (K*H, 3*K*H)
    w_red = jnp.concatenate([jnp.tile(wh1_m, (K, 1)),
                             jnp.kron(eye_k, p["wx2"])], axis=1).astype(bf16)  # (K*H, H+K)
    w_node = jnp.concatenate([p["wa1"], wh1_h, p["wh2"]], axis=1).astype(bf16)  # (H, 3H)
    b_big = jnp.concatenate([jnp.tile(p["be1"], (1, K)),
                             jnp.tile(p["be2"], (1, K)),
                             jnp.tile(p["bx1"], (1, K)),
                             jnp.tile(p["bx2"], (1, K))], axis=1).astype(f32)   # (1, 3*K*H+K)
    b_small = jnp.concatenate([p["ba1"], p["bh1"], p["bh2"],
                               p["wa2"].reshape(1, H), p["ba2"]], axis=1).astype(f32)  # (1, 4H+1)
    return (w_self, w_dist, w_bd, w_red, w_node, b_big, b_small)


def _round_up(x, m):
    return (x + m - 1) // m * m


# -----------------------------------------------------------------------------
# Forward wrapper
# -----------------------------------------------------------------------------
@functools.partial(jax.jit, static_argnames=("tm",))
def conv_egnn2_forward(ped_features, h_st, h_neigh, rela_features, neigh_mask,
                       params, tm=1024):
    bs, n, K = neigh_mask.shape
    H = h_st.shape[-1]
    M = bs * n
    KH = K * H
    f32, bf16 = jnp.float32, jnp.bfloat16

    # Effective tile: multiple of 16 sublanes (bf16-friendly), clamped to the problem size.
    # Re-derive tm downward for production shapes on v7x (64 MiB VMEM); at these sizes any
    # tm <= 4096 fits comfortably on all generations.
    tm_eff = min(tm, _round_up(M, 16))
    num_tiles = pl.cdiv(M, tm_eff)
    mp = num_tiles * tm_eff

    # Node-side auxiliary slab: [x(2), v(2), a(2), dx(K), dy(K), mask(K)]
    aux = jnp.concatenate(
        [ped_features.reshape(M, 6).astype(f32),
         rela_features[..., 0].reshape(M, K).astype(f32),
         rela_features[..., 1].reshape(M, K).astype(f32),
         neigh_mask.reshape(M, K).astype(f32)], axis=1)                  # (M, 6+3K)
    h_f = h_st.reshape(M, H).astype(f32)
    hn_f = h_neigh.reshape(M, KH).astype(bf16)                           # lane-dense neighbors

    if mp != M:                                      # pad tail rows (zeros are benign)
        pad = ((0, mp - M), (0, 0))
        aux, h_f, hn_f = jnp.pad(aux, pad), jnp.pad(h_f, pad), jnp.pad(hn_f, pad)

    packed = pack_params(params, K)

    data_specs = [
        pl.BlockSpec((tm_eff, 6 + 3 * K), lambda i: (i, 0)),
        pl.BlockSpec((tm_eff, H), lambda i: (i, 0)),
        pl.BlockSpec((tm_eff, KH), lambda i: (i, 0)),
    ]
    weight_specs = [pl.BlockSpec(w.shape, lambda i: (0, 0)) for w in packed]

    out = pl.pallas_call(
        conv_egnn2_kernel,
        out_shape=jax.ShapeDtypeStruct((mp, 6 + H), f32),
        grid=(num_tiles,),
        in_specs=data_specs + weight_specs,
        out_specs=pl.BlockSpec((tm_eff, 6 + H), lambda i: (i, 0)),
        compiler_params=pltpu.CompilerParams(
            dimension_semantics=("parallel",),
            vmem_limit_bytes=32 * 1024 * 1024,
        ),
    )(aux, h_f, hn_f, *packed)

    out = out[:M]
    return out[:, :6].reshape(bs, n, 6), out[:, 6:].reshape(bs, n, H)


# -----------------------------------------------------------------------------
# Parameter init (mimics nn.Linear default uniform init; weights stored (in, out))
# -----------------------------------------------------------------------------
def _linear_init(key, in_dim, out_dim):
    k1, k2 = jax.random.split(key)
    bound = 1.0 / np.sqrt(in_dim)
    w = jax.random.uniform(k1, (in_dim, out_dim), jnp.float32, -bound, bound)
    b = jax.random.uniform(k2, (1, out_dim), jnp.float32, -bound, bound)
    return w, b


def init_conv_egnn2_params(key, hid_dim):
    H = hid_dim  # ConvEGNN2 requires in_dim == hid_dim (residual on h_st)
    ks = jax.random.split(key, 8)
    p = {}
    p["we1"], p["be1"] = _linear_init(ks[0], 2 * H + 1, H)   # f_e Linear 1
    p["we2"], p["be2"] = _linear_init(ks[1], H, H)           # f_e Linear 2
    p["wx1"], p["bx1"] = _linear_init(ks[2], H, H)           # f_x Linear 1
    p["wx2"], p["bx2"] = _linear_init(ks[3], H, 1)           # f_x Linear 2
    p["wa1"], p["ba1"] = _linear_init(ks[4], H, H)           # f_a Linear 1
    p["wa2"], p["ba2"] = _linear_init(ks[5], H, 1)           # f_a Linear 2
    p["wh1"], p["bh1"] = _linear_init(ks[6], 2 * H, H)       # f_h Linear 1
    p["wh2"], p["bh2"] = _linear_init(ks[7], H, H)           # f_h Linear 2
    return p


# -----------------------------------------------------------------------------
# Pure-JAX f32 reference (mirrors the PyTorch module exactly)
# -----------------------------------------------------------------------------
def conv_egnn2_reference(ped, h_st, h_neigh, rel, mask, p):
    dists = jnp.linalg.norm(rel[..., :2], axis=-1, keepdims=True)         # (bs,N,K,1)
    neigh_num = jnp.sum(mask, axis=-1, keepdims=True)                     # (bs,N,1)
    h_rep = jnp.broadcast_to(h_st[..., None, :], h_neigh.shape)
    tmp = jnp.concatenate([h_rep, h_neigh, dists], axis=-1)
    m_ij = jax.nn.silu(jax.nn.silu(tmp @ p["we1"] + p["be1"]) @ p["we2"] + p["be2"])
    fx = jax.nn.silu(m_ij @ p["wx1"] + p["bx1"]) @ p["wx2"] + p["bx2"]
    agg = rel[..., :2] * fx * mask[..., None]
    agg = (1.0 / (neigh_num + 1e-6)) * jnp.sum(agg, axis=-2)
    fa = jax.nn.silu(h_st @ p["wa1"] + p["ba1"]) @ p["wa2"] + p["ba2"]
    a_new = fa * ped[..., 4:6] + agg
    v_new = ped[..., 2:4] + a_new
    x_new = ped[..., 0:2] + v_new
    m_i = jnp.sum(m_ij, axis=-2)                                          # unmasked, as in torch
    h_new = h_st + jax.nn.silu(
        jnp.concatenate([h_st, m_i], axis=-1) @ p["wh1"] + p["bh1"]) @ p["wh2"] + p["bh2"]
    return jnp.concatenate([x_new, v_new, a_new], axis=-1), h_new


# -----------------------------------------------------------------------------
if __name__ == "__main__":
    bs, N, K, H = 2, 8, 4, 32        # K*H = 128 -> lane-dense neighbor slab
    root = jax.random.PRNGKey(0)
    kp, k1, k2, k3, k4, k5 = jax.random.split(root, 6)

    ped = jax.random.normal(k1, (bs, N, 6), jnp.float32)
    h_st = jax.random.normal(k2, (bs, N, H), jnp.float32)
    h_neigh = jax.random.normal(k3, (bs, N, K, H), jnp.float32)
    rel = jax.random.normal(k4, (bs, N, K, 6), jnp.float32)
    mask = (jax.random.uniform(k5, (bs, N, K)) > 0.3).astype(jnp.float32)

    params = init_conv_egnn2_params(kp, H)

    ped_out, h_out = conv_egnn2_forward(ped, h_st, h_neigh, rel, mask, params)
    ped_out, h_out = jax.block_until_ready((ped_out, h_out))

    assert ped_out.shape == (bs, N, 6) and h_out.shape == (bs, N, H)
    assert bool(jnp.all(jnp.isfinite(ped_out))) and bool(jnp.all(jnp.isfinite(h_out)))

    # Sanity-check against the f32 reference (kernel uses bf16 MXU operands -> loose tol).
    ped_ref, h_ref = conv_egnn2_reference(ped, h_st, h_neigh, rel, mask, params)
    err = max(float(jnp.max(jnp.abs(ped_out - ped_ref))),
              float(jnp.max(jnp.abs(h_out - h_ref))))
    assert err < 1e-1, f"max abs error vs reference: {err}"

    print("KERNEL_OK")
</pallas_src>

<mosaic_0001>
module attributes {stable_mosaic.version = 11 : i64} {
  func.func @conv_egnn2_kernel(%arg0: i32, %arg1: memref<16x18xf32, #tpu.memory_space<vmem>>, %arg2: memref<16x32xf32, #tpu.memory_space<vmem>>, %arg3: memref<16x128xbf16, #tpu.memory_space<vmem>>, %arg4: memref<32x128xbf16, #tpu.memory_space<vmem>>, %arg5: memref<4x128xbf16, #tpu.memory_space<vmem>>, %arg6: memref<128x384xbf16, #tpu.memory_space<vmem>>, %arg7: memref<128x36xbf16, #tpu.memory_space<vmem>>, %arg8: memref<32x96xbf16, #tpu.memory_space<vmem>>, %arg9: memref<1x388xf32, #tpu.memory_space<vmem>>, %arg10: memref<1x129xf32, #tpu.memory_space<vmem>>, %arg11: memref<16x38xf32, #tpu.memory_space<vmem>>) attributes {dimension_semantics = [#tpu.dimension_semantics<parallel>], iteration_bounds = array<i64: 1>, scalar_prefetch = 0 : i64, scratch_operands = 0 : i64, tpu.core_type = #tpu.core_type<tc>, window_params = [{transform_indices = @transform_0, window_bounds = array<i64: 16, 18>}, {transform_indices = @transform_1, window_bounds = array<i64: 16, 32>}, {transform_indices = @transform_2, window_bounds = array<i64: 16, 128>}, {pipeline_mode = #tpu.pipeline_mode<synchronous>, transform_indices = @transform_3, window_bounds = array<i64: 32, 128>}, {pipeline_mode = #tpu.pipeline_mode<synchronous>, transform_indices = @transform_4, window_bounds = array<i64: 4, 128>}, {pipeline_mode = #tpu.pipeline_mode<synchronous>, transform_indices = @transform_5, window_bounds = array<i64: 128, 384>}, {pipeline_mode = #tpu.pipeline_mode<synchronous>, transform_indices = @transform_6, window_bounds = array<i64: 128, 36>}, {pipeline_mode = #tpu.pipeline_mode<synchronous>, transform_indices = @transform_7, window_bounds = array<i64: 32, 96>}, {pipeline_mode = #tpu.pipeline_mode<synchronous>, transform_indices = @transform_8, window_bounds = array<i64: 1, 388>}, {pipeline_mode = #tpu.pipeline_mode<synchronous>, transform_indices = @transform_9, window_bounds = array<i64: 1, 129>}, {transform_indices = @transform_10, window_bounds = array<i64: 16, 38>}]} {
    %c0 = arith.constant 0 : index
    %c0_0 = arith.constant 0 : index
    %0 = vector.load %arg2[%c0, %c0_0] : memref<16x32xf32, #tpu.memory_space<vmem>>, vector<16x32xf32>
    %c0_1 = arith.constant 0 : index
    %c0_2 = arith.constant 0 : index
    %1 = vector.load %arg3[%c0_1, %c0_2] : memref<16x128xbf16, #tpu.memory_space<vmem>>, vector<16x128xbf16>
    %c0_3 = arith.constant 0 : index
    %c0_4 = arith.constant 0 : index
    %2 = vector.load %arg1[%c0_3, %c0_4] : memref<16x18xf32, #tpu.memory_space<vmem>>, vector<16x18xf32>
    %3 = vector.extract_strided_slice %2 {offsets = [0, 0], sizes = [16, 2], strides = [1, 1]} : vector<16x18xf32> to vector<16x2xf32>
    %4 = vector.extract_strided_slice %2 {offsets = [0, 2], sizes = [16, 2], strides = [1, 1]} : vector<16x18xf32> to vector<16x2xf32>
    %5 = vector.extract_strided_slice %2 {offsets = [0, 4], sizes = [16, 2], strides = [1, 1]} : vector<16x18xf32> to vector<16x2xf32>
    %6 = vector.extract_strided_slice %2 {offsets = [0, 6], sizes = [16, 4], strides = [1, 1]} : vector<16x18xf32> to vector<16x4xf32>
    %7 = vector.extract_strided_slice %2 {offsets = [0, 10], sizes = [16, 4], strides = [1, 1]} : vector<16x18xf32> to vector<16x4xf32>
    %8 = vector.extract_strided_slice %2 {offsets = [0, 14], sizes = [16, 4], strides = [1, 1]} : vector<16x18xf32> to vector<16x4xf32>
    %c0_5 = arith.constant 0 : index
    %c0_6 = arith.constant 0 : index
    %9 = vector.load %arg4[%c0_5, %c0_6] : memref<32x128xbf16, #tpu.memory_space<vmem>>, vector<32x128xbf16>
    %c0_7 = arith.constant 0 : index
    %c0_8 = arith.constant 0 : index
    %10 = vector.load %arg5[%c0_7, %c0_8] : memref<4x128xbf16, #tpu.memory_space<vmem>>, vector<4x128xbf16>
    %c0_9 = arith.constant 0 : index
    %c0_10 = arith.constant 0 : index
    %11 = vector.load %arg6[%c0_9, %c0_10] : memref<128x384xbf16, #tpu.memory_space<vmem>>, vector<128x128xbf16>
    %c0_11 = arith.constant 0 : index
    %c128 = arith.constant 128 : index
    %12 = vector.load %arg6[%c0_11, %c128] : memref<128x384xbf16, #tpu.memory_space<vmem>>, vector<128x128xbf16>
    %c0_12 = arith.constant 0 : index
    %c256 = arith.constant 256 : index
    %13 = vector.load %arg6[%c0_12, %c256] : memref<128x384xbf16, #tpu.memory_space<vmem>>, vector<128x128xbf16>
    %c0_13 = arith.constant 0 : index
    %c0_14 = arith.constant 0 : index
    %14 = vector.load %arg7[%c0_13, %c0_14] : memref<128x36xbf16, #tpu.memory_space<vmem>>, vector<128x32xbf16>
    %c0_15 = arith.constant 0 : index
    %c32 = arith.constant 32 : index
    %15 = vector.load %arg7[%c0_15, %c32] : memref<128x36xbf16, #tpu.memory_space<vmem>>, vector<128x4xbf16>
    %c0_16 = arith.constant 0 : index
    %c0_17 = arith.constant 0 : index
    %16 = vector.load %arg8[%c0_16, %c0_17] : memref<32x96xbf16, #tpu.memory_space<vmem>>, vector<32x32xbf16>
    %c0_18 = arith.constant 0 : index
    %c32_19 = arith.constant 32 : index
    %17 = vector.load %arg8[%c0_18, %c32_19] : memref<32x96xbf16, #tpu.memory_space<vmem>>, vector<32x32xbf16>
    %c0_20 = arith.constant 0 : index
    %c64 = arith.constant 64 : index
    %18 = vector.load %arg8[%c0_20, %c64] : memref<32x96xbf16, #tpu.memory_space<vmem>>, vector<32x32xbf16>
    %c0_21 = arith.constant 0 : index
    %c0_22 = arith.constant 0 : index
    %19 = vector.load %arg9[%c0_21, %c0_22] : memref<1x388xf32, #tpu.memory_space<vmem>>, vector<1x128xf32>
    %c0_23 = arith.constant 0 : index
    %c128_24 = arith.constant 128 : index
    %20 = vector.load %arg9[%c0_23, %c128_24] : memref<1x388xf32, #tpu.memory_space<vmem>>, vector<1x128xf32>
    %c0_25 = arith.constant 0 : index
    %c256_26 = arith.constant 256 : index
    %21 = vector.load %arg9[%c0_25, %c256_26] : memref<1x388xf32, #tpu.memory_space<vmem>>, vector<1x128xf32>
    %c0_27 = arith.constant 0 : index
    %c384 = arith.constant 384 : index
    %22 = vector.load %arg9[%c0_27, %c384] : memref<1x388xf32, #tpu.memory_space<vmem>>, vector<1x4xf32>
    %c0_28 = arith.constant 0 : index
    %c0_29 = arith.constant 0 : index
    %23 = vector.load %arg10[%c0_28, %c0_29] : memref<1x129xf32, #tpu.memory_space<vmem>>, vector<1x32xf32>
    %c0_30 = arith.constant 0 : index
    %c32_31 = arith.constant 32 : index
    %24 = vector.load %arg10[%c0_30, %c32_31] : memref<1x129xf32, #tpu.memory_space<vmem>>, vector<1x32xf32>
    %c0_32 = arith.constant 0 : index
    %c64_33 = arith.constant 64 : index
    %25 = vector.load %arg10[%c0_32, %c64_33] : memref<1x129xf32, #tpu.memory_space<vmem>>, vector<1x32xf32>
    %c0_34 = arith.constant 0 : index
    %c96 = arith.constant 96 : index
    %26 = vector.load %arg10[%c0_34, %c96] : memref<1x129xf32, #tpu.memory_space<vmem>>, vector<1x32xf32>
    %c0_35 = arith.constant 0 : index
    %c128_36 = arith.constant 128 : index
    %27 = vector.load %arg10[%c0_35, %c128_36] : memref<1x129xf32, #tpu.memory_space<vmem>>, vector<1x1xf32>
    %28 = arith.truncf %0 : vector<16x32xf32> to vector<16x32xbf16>
    %29 = arith.mulf %6, %6 : vector<16x4xf32>
    %30 = arith.mulf %7, %7 : vector<16x4xf32>
    %31 = arith.addf %29, %30 : vector<16x4xf32>
    %32 = math.sqrt %31 : vector<16x4xf32>
    %cst = arith.constant dense<0.000000e+00> : vector<16x128xf32>
    %33 = tpu.matmul %28, %9, %cst {dimension_numbers = #tpu.dot_dimension_numbers<[1], [0], [0], [1], [0, 0, 1, 1], [], []>} : vector<16x32xbf16>, vector<32x128xbf16>, vector<16x128xf32> -> vector<16x128xf32>
    %cst_37 = arith.constant dense<0.000000e+00> : vector<16x128xf32>
    %34 = tpu.matmul %1, %11, %cst_37 {dimension_numbers = #tpu.dot_dimension_numbers<[1], [0], [0], [1], [0, 0, 1, 1], [], []>} : vector<16x128xbf16>, vector<128x128xbf16>, vector<16x128xf32> -> vector<16x128xf32>
    %35 = arith.addf %33, %34 : vector<16x128xf32>
    %36 = arith.truncf %32 : vector<16x4xf32> to vector<16x4xbf16>
    %cst_38 = arith.constant dense<0.000000e+00> : vector<16x128xf32>
    %37 = tpu.matmul %36, %10, %cst_38 {dimension_numbers = #tpu.dot_dimension_numbers<[1], [0], [0], [1], [0, 0, 1, 1], [], []>} : vector<16x4xbf16>, vector<4x128xbf16>, vector<16x128xf32> -> vector<16x128xf32>
    %38 = arith.addf %35, %37 : vector<16x128xf32>
    %39 = vector.broadcast %19 : vector<1x128xf32> to vector<16x128xf32>
    %40 = arith.addf %38, %39 : vector<16x128xf32>
    %41 = arith.negf %40 : vector<16x128xf32>
    %42 = math.exp %41 : vector<16x128xf32>
    %cst_39 = arith.constant 1.000000e+00 : f32
    %43 = vector.broadcast %cst_39 : f32 to vector<16x128xf32>
    %44 = arith.addf %43, %42 : vector<16x128xf32>
    %45 = arith.divf %43, %44 : vector<16x128xf32>
    %46 = arith.mulf %40, %45 : vector<16x128xf32>
    %47 = arith.truncf %46 : vector<16x128xf32> to vector<16x128xbf16>
    %cst_40 = arith.constant dense<0.000000e+00> : vector<16x128xf32>
    %48 = tpu.matmul %47, %12, %cst_40 {dimension_numbers = #tpu.dot_dimension_numbers<[1], [0], [0], [1], [0, 0, 1, 1], [], []>} : vector<16x128xbf16>, vector<128x128xbf16>, vector<16x128xf32> -> vector<16x128xf32>
    %49 = vector.broadcast %20 : vector<1x128xf32> to vector<16x128xf32>
    %50 = arith.addf %48, %49 : vector<16x128xf32>
    %51 = arith.negf %50 : vector<16x128xf32>
    %52 = math.exp %51 : vector<16x128xf32>
    %cst_41 = arith.constant 1.000000e+00 : f32
    %53 = vector.broadcast %cst_41 : f32 to vector<16x128xf32>
    %54 = arith.addf %53, %52 : vector<16x128xf32>
    %55 = arith.divf %53, %54 : vector<16x128xf32>
    %56 = arith.mulf %50, %55 : vector<16x128xf32>
    %57 = arith.truncf %56 : vector<16x128xf32> to vector<16x128xbf16>
    %cst_42 = arith.constant dense<0.000000e+00> : vector<16x128xf32>
    %58 = tpu.matmul %57, %13, %cst_42 {dimension_numbers = #tpu.dot_dimension_numbers<[1], [0], [0], [1], [0, 0, 1, 1], [], []>} : vector<16x128xbf16>, vector<128x128xbf16>, vector<16x128xf32> -> vector<16x128xf32>
    %59 = vector.broadcast %21 : vector<1x128xf32> to vector<16x128xf32>
    %60 = arith.addf %58, %59 : vector<16x128xf32>
    %61 = arith.negf %60 : vector<16x128xf32>
    %62 = math.exp %61 : vector<16x128xf32>
    %cst_43 = arith.constant 1.000000e+00 : f32
    %63 = vector.broadcast %cst_43 : f32 to vector<16x128xf32>
    %64 = arith.addf %63, %62 : vector<16x128xf32>
    %65 = arith.divf %63, %64 : vector<16x128xf32>
    %66 = arith.mulf %60, %65 : vector<16x128xf32>
    %67 = arith.truncf %66 : vector<16x128xf32> to vector<16x128xbf16>
    %cst_44 = arith.constant dense<0.000000e+00> : vector<16x4xf32>
    %68 = tpu.matmul %67, %15, %cst_44 {dimension_numbers = #tpu.dot_dimension_numbers<[1], [0], [0], [1], [0, 0, 1, 1], [], []>} : vector<16x128xbf16>, vector<128x4xbf16>, vector<16x4xf32> -> vector<16x4xf32>
    %69 = vector.broadcast %22 : vector<1x4xf32> to vector<16x4xf32>
    %70 = arith.addf %68, %69 : vector<16x4xf32>
    %71 = arith.mulf %70, %8 : vector<16x4xf32>
    %cst_45 = arith.constant dense<0.000000e+00> : vector<16xf32>
    %72 = vector.multi_reduction <add>, %8, %cst_45 [1] : vector<16x4xf32> to vector<16xf32>
    %73 = vector.shape_cast %72 : vector<16xf32> to vector<16x1xf32>
    %cst_46 = arith.constant 9.99999997E-7 : f32
    %74 = vector.broadcast %cst_46 : f32 to vector<16x1xf32>
    %75 = arith.addf %73, %74 : vector<16x1xf32>
    %76 = tpu.reciprocal %75 {approx = true} : vector<16x1xf32> -> vector<16x1xf32>
    %77 = arith.mulf %6, %71 : vector<16x4xf32>
    %cst_47 = arith.constant dense<0.000000e+00> : vector<16xf32>
    %78 = vector.multi_reduction <add>, %77, %cst_47 [1] : vector<16x4xf32> to vector<16xf32>
    %79 = vector.shape_cast %78 : vector<16xf32> to vector<16x1xf32>
    %80 = arith.mulf %79, %76 : vector<16x1xf32>
    %81 = arith.mulf %7, %71 : vector<16x4xf32>
    %cst_48 = arith.constant dense<0.000000e+00> : vector<16xf32>
    %82 = vector.multi_reduction <add>, %81, %cst_48 [1] : vector<16x4xf32> to vector<16xf32>
    %83 = vector.shape_cast %82 : vector<16xf32> to vector<16x1xf32>
    %84 = arith.mulf %83, %76 : vector<16x1xf32>
    %cst_49 = arith.constant dense<0.000000e+00> : vector<16x32xf32>
    %85 = tpu.matmul %28, %16, %cst_49 {dimension_numbers = #tpu.dot_dimension_numbers<[1], [0], [0], [1], [0, 0, 1, 1], [], []>} : vector<16x32xbf16>, vector<32x32xbf16>, vector<16x32xf32> -> vector<16x32xf32>
    %86 = vector.broadcast %23 : vector<1x32xf32> to vector<16x32xf32>
    %87 = arith.addf %85, %86 : vector<16x32xf32>
    %88 = arith.negf %87 : vector<16x32xf32>
    %89 = math.exp %88 : vector<16x32xf32>
    %cst_50 = arith.constant 1.000000e+00 : f32
    %90 = vector.broadcast %cst_50 : f32 to vector<16x32xf32>
    %91 = arith.addf %90, %89 : vector<16x32xf32>
    %92 = arith.divf %90, %91 : vector<16x32xf32>
    %93 = arith.mulf %87, %92 : vector<16x32xf32>
    %94 = vector.broadcast %26 : vector<1x32xf32> to vector<16x32xf32>
    %95 = arith.mulf %93, %94 : vector<16x32xf32>
    %cst_51 = arith.constant dense<0.000000e+00> : vector<16xf32>
    %96 = vector.multi_reduction <add>, %95, %cst_51 [1] : vector<16x32xf32> to vector<16xf32>
    %97 = vector.shape_cast %96 : vector<16xf32> to vector<16x1xf32>
    %98 = vector.broadcast %27 : vector<1x1xf32> to vector<16x1xf32>
    %99 = arith.addf %97, %98 : vector<16x1xf32>
    %100 = vector.broadcast %99 : vector<16x1xf32> to vector<16x2xf32>
    %101 = arith.mulf %100, %5 : vector<16x2xf32>
    %102 = tpu.concatenate %80, %84 in 1 : vector<16x1xf32>, vector<16x1xf32> -> vector<16x2xf32>
    %103 = arith.addf %101, %102 : vector<16x2xf32>
    %104 = arith.addf %4, %103 : vector<16x2xf32>
    %105 = arith.addf %3, %104 : vector<16x2xf32>
    %cst_52 = arith.constant dense<0.000000e+00> : vector<16x32xf32>
    %106 = tpu.matmul %28, %17, %cst_52 {dimension_numbers = #tpu.dot_dimension_numbers<[1], [0], [0], [1], [0, 0, 1, 1], [], []>} : vector<16x32xbf16>, vector<32x32xbf16>, vector<16x32xf32> -> vector<16x32xf32>
    %cst_53 = arith.constant dense<0.000000e+00> : vector<16x32xf32>
    %107 = tpu.matmul %57, %14, %cst_53 {dimension_numbers = #tpu.dot_dimension_numbers<[1], [0], [0], [1], [0, 0, 1, 1], [], []>} : vector<16x128xbf16>, vector<128x32xbf16>, vector<16x32xf32> -> vector<16x32xf32>
    %108 = arith.addf %106, %107 : vector<16x32xf32>
    %109 = vector.broadcast %24 : vector<1x32xf32> to vector<16x32xf32>
    %110 = arith.addf %108, %109 : vector<16x32xf32>
    %111 = arith.negf %110 : vector<16x32xf32>
    %112 = math.exp %111 : vector<16x32xf32>
    %cst_54 = arith.constant 1.000000e+00 : f32
    %113 = vector.broadcast %cst_54 : f32 to vector<16x32xf32>
    %114 = arith.addf %113, %112 : vector<16x32xf32>
    %115 = arith.divf %113, %114 : vector<16x32xf32>
    %116 = arith.mulf %110, %115 : vector<16x32xf32>
    %117 = arith.truncf %116 : vector<16x32xf32> to vector<16x32xbf16>
    %cst_55 = arith.constant dense<0.000000e+00> : vector<16x32xf32>
    %118 = tpu.matmul %117, %18, %cst_55 {dimension_numbers = #tpu.dot_dimension_numbers<[1], [0], [0], [1], [0, 0, 1, 1], [], []>} : vector<16x32xbf16>, vector<32x32xbf16>, vector<16x32xf32> -> vector<16x32xf32>
    %119 = arith.addf %0, %118 : vector<16x32xf32>
    %120 = vector.broadcast %25 : vector<1x32xf32> to vector<16x32xf32>
    %121 = arith.addf %119, %120 : vector<16x32xf32>
    %122 = tpu.concatenate %105, %104, %103, %121 in 1 : vector<16x2xf32>, vector<16x2xf32>, vector<16x2xf32>, vector<16x32xf32> -> vector<16x38xf32>
    %c0_56 = arith.constant 0 : index
    %c0_57 = arith.constant 0 : index
    %123 = vector.load %arg11[%c0_56, %c0_57] : memref<16x38xf32, #tpu.memory_space<vmem>>, vector<16x38xf32>
    tpu.vector_store %arg11[%c0_56, %c0_57], %122 {strides = array<i32>} : memref<16x38xf32, #tpu.memory_space<vmem>>, vector<16x38xf32>,
    return
  }
  func.func @transform_0(%arg0: i32) -> (i32, i32) {
    %c0_i32 = arith.constant 0 : i32
    %c0_i32_0 = arith.constant 0 : i32
    return %arg0, %c0_i32 : i32, i32
  }
  func.func @transform_1(%arg0: i32) -> (i32, i32) {
    %c0_i32 = arith.constant 0 : i32
    %c0_i32_0 = arith.constant 0 : i32
    return %arg0, %c0_i32 : i32, i32
  }
  func.func @transform_2(%arg0: i32) -> (i32, i32) {
    %c0_i32 = arith.constant 0 : i32
    %c0_i32_0 = arith.constant 0 : i32
    return %arg0, %c0_i32 : i32, i32
  }
  func.func @transform_3(%arg0: i32) -> (i32, i32) {
    %c0_i32 = arith.constant 0 : i32
    %c0_i32_0 = arith.constant 0 : i32
    %c0_i32_1 = arith.constant 0 : i32
    return %c0_i32, %c0_i32_0 : i32, i32
  }
  func.func @transform_4(%arg0: i32) -> (i32, i32) {
    %c0_i32 = arith.constant 0 : i32
    %c0_i32_0 = arith.constant 0 : i32
    %c0_i32_1 = arith.constant 0 : i32
    return %c0_i32, %c0_i32_0 : i32, i32
  }
  func.func @transform_5(%arg0: i32) -> (i32, i32) {
    %c0_i32 = arith.constant 0 : i32
    %c0_i32_0 = arith.constant 0 : i32
    %c0_i32_1 = arith.constant 0 : i32
    return %c0_i32, %c0_i32_0 : i32, i32
  }
  func.func @transform_6(%arg0: i32) -> (i32, i32) {
    %c0_i32 = arith.constant 0 : i32
    %c0_i32_0 = arith.constant 0 : i32
    %c0_i32_1 = arith.constant 0 : i32
    return %c0_i32, %c0_i32_0 : i32, i32
  }
  func.func @transform_7(%arg0: i32) -> (i32, i32) {
    %c0_i32 = arith.constant 0 : i32
    %c0_i32_0 = arith.constant 0 : i32
    %c0_i32_1 = arith.constant 0 : i32
    return %c0_i32, %c0_i32_0 : i32, i32
  }
  func.func @transform_8(%arg0: i32) -> (i32, i32) {
    %c0_i32 = arith.constant 0 : i32
    %c0_i32_0 = arith.constant 0 : i32
    %c0_i32_1 = arith.constant 0 : i32
    return %c0_i32, %c0_i32_0 : i32, i32
  }
  func.func @transform_9(%arg0: i32) -> (i32, i32) {
    %c0_i32 = arith.constant 0 : i32
    %c0_i32_0 = arith.constant 0 : i32
    %c0_i32_1 = arith.constant 0 : i32
    return %c0_i32, %c0_i32_0 : i32, i32
  }
  func.func @transform_10(%arg0: i32) -> (i32, i32) {
    %c0_i32 = arith.constant 0 : i32
    %c0_i32_0 = arith.constant 0 : i32
    return %arg0, %c0_i32 : i32, i32
  }
}

</mosaic_0001>

<bundles_post_ra>
// kernel: tile.0
= control target key start
LH: loop header
LB: loop body
LE: loop exit
PB: predicated region body
PF: predicated region fallthrough
CT: control target
= control target key end

     0   :  { %vm515_vm0 = vcmask 1047556   ;;  %vm517_vm1 = vcmask 261120   ;;  %s814_s24 = smov 96   ;;  %s815_s25 = smov 32   ;;  %vm597_vm2 = vcmask 785920   ;;  %vm554_vm3 = vcmask 1048320   ;;  %s887_s0 = inlined_call_operand.vmem [shape: bf16[4,32,32], index: 0, kind: input, shape index: {}]   ;;  %s888_s1 = inlined_call_operand.vmem [shape: bf16[128,32], index: 1, kind: output, shape index: {}]  }
   0x1   :  { %v751_v0 = vld [vmem:[%s887_s0 + $0x1a] sm:$0xff]   ;;  %v754_v1 = vld [vmem:[%s887_s0 + $0x12] sm:$0xff]   ;;  %v758_v2 = vld [vmem:[%s887_s0 + $0xa] sm:$0xff]   ;;  %vm640_vm4 = vcmask 523520  }
   0x2   :  { %v273_v3 = vunpack.c.h.bf16 %v751_v0  ;;  %v289_v4 = vunpack.c.l.bf16 %v751_v0  ;;  %v321_v5 = vunpack.c.h.bf16 %v754_v1  ;;  %v762_v6 = vld [vmem:[%s887_s0 + $0x2] sm:$0xff]   ;;  %v353_v8 = vunpack.c.l.bf16 %v754_v1  ;;  %v735_v10 = vld [vmem:[%s887_s0 + $0x38] sm:$0xff]   ;;  %v739_v13 = vld [vmem:[%s887_s0 + $0x30] sm:$0xff]  }
   0x3   :  { %v509_v7 = vld [vmem:[%s887_s0] ss:$34 sps:$2 sm:$0xf]   ;;  %v385_v9 = vunpack.c.h.bf16 %v758_v2  ;;  %v417_v11 = vunpack.c.l.bf16 %v758_v2  ;;  %v449_v12 = vunpack.c.h.bf16 %v762_v6  ;;  %v481_v14 = vunpack.c.l.bf16 %v762_v6  ;;  %v743_v16 = vld [vmem:[%s887_s0 + $0x28] sm:$0xff]   ;;  %v747_v19 = vld [vmem:[%s887_s0 + $0x24] sm:$0xf]  }
   0x4   :  { %276 = vst [vmem:[#allocation1 + $0x78] ss:$8 sps:$4 sm:$0xff] %v273_v3   ;;  %292 = vst [vmem:[#allocation1 + $0x68] ss:$8 sps:$4 sm:$0xff] %v289_v4   ;;  %v510_v15 = vunpack.c.l.bf16 %v509_v7  ;;  %v17_v17 = vunpack.c.h.bf16 %v735_v10  ;;  %v49_v18 = vunpack.c.l.bf16 %v735_v10  ;;  %v81_v20 = vunpack.c.h.bf16 %v739_v13  ;;  %s813_s0 = smov 64  }
   0x5   :  { %324 = vst [vmem:[#allocation1 + $0x58] ss:$8 sps:$4 sm:$0xff] %v321_v5   ;;  %356 = vst [vmem:[#allocation1 + $0x48] ss:$8 sps:$4 sm:$0xff] %v353_v8   ;;  %v113_v21 = vunpack.c.l.bf16 %v739_v13  ;;  %v145_v22 = vunpack.c.h.bf16 %v743_v16  ;;  %v177_v23 = vunpack.c.l.bf16 %v743_v16  ;;  %v209_v24 = vunpack.c.l.bf16 %v747_v19 }
   0x6   :  { %388 = vst [vmem:[#allocation1 + $0x38] ss:$8 sps:$4 sm:$0xff] %v385_v9   ;;  %420 = vst [vmem:[#allocation1 + $0x28] ss:$8 sps:$4 sm:$0xff] %v417_v11  }
   0x7   :  { %452 = vst [vmem:[#allocation1 + $0x18] ss:$8 sps:$4 sm:$0xff] %v449_v12   ;;  %484 = vst [vmem:[#allocation1 + $0x8] ss:$8 sps:$4 sm:$0xff] %v481_v14  }
   0x8   :  { %512 = vst [vmem:[#allocation1] ss:$136 sps:$4 sm:$0xff] %v510_v15   ;;  %20 = vst [vmem:[#allocation1 + $0xf0] ss:$8 sps:$4 sm:$0xff] %v17_v17  }
   0x9   :  { %52 = vst [vmem:[#allocation1 + $0xe0] ss:$8 sps:$4 sm:$0xff] %v49_v18   ;;  %84 = vst [vmem:[#allocation1 + $0xd0] ss:$8 sps:$4 sm:$0xff] %v81_v20  }
   0xa   :  { %116 = vst [vmem:[#allocation1 + $0xc0] ss:$8 sps:$4 sm:$0xff] %v113_v21   ;;  %148 = vst [vmem:[#allocation1 + $0xb0] ss:$8 sps:$4 sm:$0xff] %v145_v22  }
   0xb   :  { %180 = vst [vmem:[#allocation1 + $0xa0] ss:$8 sps:$4 sm:$0xff] %v177_v23   ;;  %212 = vst [vmem:[#allocation1 + $0x90] ss:$8 sps:$4 sm:$0xff] %v209_v24  }
   0xc   :  { %v602_v25 = vld [vmem:[#allocation1 + $0x42] ss:$8 sm:$0xf0]   ;;  %v559_v26 = vld [vmem:[#allocation1 + $0x43] ss:$8 sm:$0xf0]  }
   0xd   :  { %v600_v27 = vld [vmem:[#allocation1 + $0x42] ss:$8 sm:$0xf]   ;;  %v557_v28 = vld [vmem:[#allocation1 + $0x43] ss:$8 sm:$0xf]  }
   0xe   :  { %v592_v29 = vld [vmem:[#allocation1 + $0x2] ss:$8 sm:$0xf0]   ;;  %v604_v30 = vsel %vm515_vm0, %v602_v25, %v600_v27  ;;  %v549_v31 = vld [vmem:[#allocation1 + $0x3] ss:$8 sm:$0xf0]   ;;  %v561_v32 = vsel %vm515_vm0, %v559_v26, %v557_v28 }
   0xf   :  { %v590_v33 = vld [vmem:[#allocation1 + $0x2] ss:$8 sm:$0xf]   ;;  %v547_v34 = vld [vmem:[#allocation1 + $0x3] ss:$8 sm:$0xf]  }
  0x10   :  { %v594_v35 = vsel %vm515_vm0, %v592_v29, %v590_v33  ;;  %v551_v36 = vsel %vm515_vm0, %v549_v31, %v547_v34  ;;  %v624_v37 = vld [vmem:[#allocation1 + $0xc2] ss:$8 sm:$0xf0]   ;;  %v581_v38 = vld [vmem:[#allocation1 + $0xc3] ss:$8 sm:$0xf0]  }
  0x11   :  { %v793_v39 = vpack.i.bf16 %v604_v30, %v594_v35  ;;  %v783_v40 = vpack.i.bf16 %v561_v32, %v551_v36  ;;  %v622_v41 = vld [vmem:[#allocation1 + $0xc2] ss:$8 sm:$0xf]   ;;  %v579_v42 = vld [vmem:[#allocation1 + $0xc3] ss:$8 sm:$0xf]  }
  0x12   :  { %v613_v43 = vld [vmem:[#allocation1 + $0x82] ss:$8 sm:$0xf0]   ;;  %v626_v44 = vsel %vm515_vm0, %v624_v37, %v622_v41  ;;  %v570_v45 = vld [vmem:[#allocation1 + $0x83] ss:$8 sm:$0xf0]   ;;  %v583_v46 = vsel %vm515_vm0, %v581_v38, %v579_v42 }
  0x13   :  { %794 = vrot.lane.b32.xlu1 %v793_v39, %s813_s0  ;;  %784 = vrot.lane.b32.xlu0 %v783_v40, %s814_s24  ;;  %v611_v47 = vld [vmem:[#allocation1 + $0x82] ss:$8 sm:$0xf]   ;;  %v568_v48 = vld [vmem:[#allocation1 + $0x83] ss:$8 sm:$0xf]  }
  0x14   :  { %v615_v49 = vsel %vm515_vm0, %v613_v43, %v611_v47  ;;  %v572_v50 = vsel %vm515_vm0, %v570_v45, %v568_v48  ;;  %v654_v51 = vld [vmem:[#allocation1 + $0x81] ss:$8 sm:$0xf]   ;;  %v513_v2 = vld [vmem:[#allocation1] ss:$8 sm:$0xf]  }
  0x15   :  { %v656_v52 = vld [vmem:[#allocation1 + $0x81] ss:$8 sm:$0xf0]   ;;  %v798_v53 = vpack.i.bf16 %v626_v44, %v615_v49  ;;  %v788_v54 = vpack.i.bf16 %v583_v46, %v572_v50  ;;  %v514_v3 = vld [vmem:[#allocation1] ss:$8 sm:$0xf0]  }
  0x16   :  { %v658_v55 = vsel %vm515_vm0, %v656_v52, %v654_v51  ;;  %v665_v56 = vld [vmem:[#allocation1 + $0xc1] ss:$8 sm:$0xf]   ;;  %v516_v5 = vsel %vm515_vm0, %v514_v3, %v513_v2  ;;  %v520_v6 = vld [vmem:[#allocation1 + $0x40] ss:$8 sm:$0xf]  }
  0x17   :  { %v667_v57 = vld [vmem:[#allocation1 + $0xc1] ss:$8 sm:$0xf0]   ;;  %799 = vrot.lane.b32.xlu1 %v798_v53, %s813_s0  ;;  %789 = vrot.lane.b32.xlu0 %v788_v54, %s814_s24  ;;  %v522_v7 = vld [vmem:[#allocation1 + $0x40] ss:$8 sm:$0xf0]  }
  0x18   :  { %v669_v58 = vsel %vm515_vm0, %v667_v57, %v665_v56  ;;  %v633_v59 = vld [vmem:[#allocation1 + $0x1] ss:$8 sm:$0xf]   ;;  %518 = vst.msk [vmem:[#allocation0] sm:$0xff] %vm517_vm1, %v516_v5   ;;  %v524_v8 = vsel %vm515_vm0, %v522_v7, %v520_v6 }
  0x19   :  { %v635_v60 = vld [vmem:[#allocation1 + $0x1] ss:$8 sm:$0xf0]   ;;  %v808_v61 = vpack.i.bf16 %v669_v58, %v658_v55  ;;  %v529_v9 = vld [vmem:[#allocation1 + $0x80] ss:$8 sm:$0xf]  }
  0x1a   :  { %v637_v62 = vsel %vm515_vm0, %v635_v60, %v633_v59  ;;  %v643_v63 = vld [vmem:[#allocation1 + $0x41] ss:$8 sm:$0xf]   ;;  %v531_v10 = vld [vmem:[#allocation1 + $0x80] ss:$8 sm:$0xf0]  }
  0x1b   :  { %v645_v0 = vld [vmem:[#allocation1 + $0x41] ss:$8 sm:$0xf0]   ;;  %809 = vrot.lane.b32.xlu1 %v808_v61, %s815_s25  ;;  %527 = vst.msk [vmem:[#allocation0 + $0x8] sm:$0xff] %vm517_vm1, %v524_v8   ;;  %v533_v11 = vsel %vm515_vm0, %v531_v10, %v529_v9 }
  0x1c   :  { %v647_v1 = vsel %vm515_vm0, %v645_v0, %v643_v63  ;;  %v538_v12 = vld [vmem:[#allocation1 + $0xc0] ss:$8 sm:$0xf]   ;;  %536 = vst.msk [vmem:[#allocation0 + $0x10] sm:$0xff] %vm517_vm1, %v533_v11  }
  0x1d   :  { %v803_v4 = vpack.i.bf16 %v647_v1, %v637_v62  ;;  %v540_v13 = vld [vmem:[#allocation1 + $0xc0] ss:$8 sm:$0xf0]  }
  0x1e   :  { %v542_v14 = vsel %vm515_vm0, %v540_v13, %v538_v12 }
  0x1f   :  { %804 = vrot.lane.b32.xlu0 %v803_v4, %s815_s25  ;;  %545 = vst.msk [vmem:[#allocation0 + $0x18] sm:$0xff] %vm517_vm1, %v542_v14  }
  0x85   :  { %v795_v15 = vpop.permute.xlu1 %794  ;;  %v785_v16 = vpop.permute.xlu0 %784 }
  0x86   :  { %v797_v17 = vunpack.i.h.bf16 %v795_v15  ;;  %v796_v18 = vunpack.i.l.bf16 %v795_v15  ;;  %v787_v19 = vunpack.i.h.bf16 %v785_v16  ;;  %v786_v20 = vunpack.i.l.bf16 %v785_v16 }
  0x88   :  { %555 = vst.msk [vmem:[#allocation0] sm:$0xff] %vm554_vm3, %v786_v20   ;;  %566 = vst.msk [vmem:[#allocation0 + $0x8] sm:$0xff] %vm554_vm3, %v787_v19  }
  0x89   :  { %598 = vst.msk [vmem:[#allocation0] sm:$0xff] %vm597_vm2, %v796_v18   ;;  %609 = vst.msk [vmem:[#allocation0 + $0x8] sm:$0xff] %vm597_vm2, %v797_v17   ;;  %v800_v21 = vpop.permute.xlu1 %799  ;;  %v790_v22 = vpop.permute.xlu0 %789 }
  0x8a   :  { %v802_v23 = vunpack.i.h.bf16 %v800_v21  ;;  %v801_v24 = vunpack.i.l.bf16 %v800_v21  ;;  %v792_v25 = vunpack.i.h.bf16 %v790_v22  ;;  %v791_v26 = vunpack.i.l.bf16 %v790_v22 }
  0x8c   :  { %577 = vst.msk [vmem:[#allocation0 + $0x10] sm:$0xff] %vm554_vm3, %v791_v26   ;;  %588 = vst.msk [vmem:[#allocation0 + $0x18] sm:$0xff] %vm554_vm3, %v792_v25  }
  0x8d   :  { %620 = vst.msk [vmem:[#allocation0 + $0x10] sm:$0xff] %vm597_vm2, %v801_v24   ;;  %631 = vst.msk [vmem:[#allocation0 + $0x18] sm:$0xff] %vm597_vm2, %v802_v23   ;;  %v810_v27 = vpop.permute.xlu1 %809 }
  0x8e   :  { %v812_v29 = vunpack.i.h.bf16 %v810_v27  ;;  %v811_v30 = vunpack.i.l.bf16 %v810_v27 }
  0x90   :  { %663 = vst.msk [vmem:[#allocation0 + $0x10] sm:$0xff] %vm640_vm4, %v811_v30   ;;  %674 = vst.msk [vmem:[#allocation0 + $0x18] sm:$0xff] %vm640_vm4, %v812_v29  }
  0x91   :  { %v805_v28 = vpop.permute.xlu0 %804 }
  0x92   :  { %v807_v31 = vunpack.i.h.bf16 %v805_v28  ;;  %v806_v32 = vunpack.i.l.bf16 %v805_v28 }
  0x94   :  { %652 = vst.msk [vmem:[#allocation0 + $0x8] sm:$0xff] %vm640_vm4, %v807_v31   ;;  %641 = vst.msk [vmem:[#allocation0] sm:$0xff] %vm640_vm4, %v806_v32  }
  0x97   :  { %v690_v33 = vld [vmem:[#allocation0 + $0x10] sm:$0xff]  ;;  %v697_v34 = vld [vmem:[#allocation0 + $0x18] sm:$0xff] }
  0x98   :  { %v777_v36 = vpack.c.bf16 %v697_v34, %v690_v33 }
  0x9a   :  { %779 = vst [vmem:[%s888_s1 + $0x8] sm:$0xff] %v777_v36  }
  0x9b   :  { %v684_v35 = vld [vmem:[#allocation0 + $0x8] sm:$0xff]  ;;  %v679_v37 = vld [vmem:[#allocation0] sm:$0xff] }
  0x9c   :  { %v772_v38 = vpack.c.bf16 %v684_v35, %v679_v37 }
  0x9e   :  { %773 = vst [vmem:[%s888_s1] sm:$0xff] %v772_v38  }

// kernel: conv_egnn2_forward.1
= control target key start
LH: loop header
LB: loop body
LE: loop exit
PB: predicated region body
PF: predicated region fallthrough
CT: control target
= control target key end

     0   :  { %s1470_s17 = smov 124   ;;  %v1471_v4 = vmov 0.0   ;;  %vm1472_vm0 = vmmov 0   ;;  %vm308_vm1 = vcmask 1041408   ;;  %vm255_vm2 = vcmask 261120   ;;  %s1476_s15 = smov 6   ;;  %s1852_s0 = inlined_call_operand.vmem [shape: f32[16,18], index: 0, kind: input, shape index: {}]   ;;  %s1853_s5 = inlined_call_operand.vmem [shape: bf16[128,384], index: 5, kind: input, shape index: {}]   ;;  %s1854_s3 = inlined_call_operand.vmem [shape: bf16[32,128], index: 3, kind: input, shape index: {}]   ;;  %s1855_s1 = inlined_call_operand.vmem [shape: f32[16,32], index: 1, kind: input, shape index: {}]   ;;  %s1856_s4 = inlined_call_operand.vmem [shape: bf16[4,128], index: 4, kind: input, shape index: {}]   ;;  %s1857_s2 = inlined_call_operand.vmem [shape: bf16[16,128], index: 2, kind: input, shape index: {}]   ;;  %s1858_s8 = inlined_call_operand.vmem [shape: f32[1,388], index: 8, kind: input, shape index: {}]   ;;  %s1859_s7 = inlined_call_operand.vmem [shape: bf16[32,96], index: 7, kind: input, shape index: {}]   ;;  %s1860_s6 = inlined_call_operand.vmem [shape: bf16[128,36], index: 6, kind: input, shape index: {}]   ;;  %s1861_s9 = inlined_call_operand.vmem [shape: f32[1,129], index: 9, kind: input, shape index: {}]   ;;  %s1862_s10 = inlined_call_operand.vmem [shape: f32[16,38], index: 10, kind: output, shape index: {}]  }
   0x1   :  { %v1542_v0 = vld [vmem:[%s1852_s0] sm:$0xff]  ;;  %v1547_v1 = vld [vmem:[%s1852_s0 + $0x8] sm:$0xff]  ;;  %1229 = vmatprep.subr.bf16.mxu0 %v1471_v4  ;;  %1249 = vmatprep.subr.bf16.mxu1 %v1471_v4  ;;  %v1385_v7 = vld [vmem:[%s1853_s5 + $0x30] ss:$12 sps:$4 sm:$0xff]   ;;  %vm304_vm7 = vcmask 31744   ;;  %vm883_vm8 = vcmask 7168  }
   0x2   :  { %v122_v2 = vmul.f32 %v1542_v0, %v1542_v0  ;;  %v123_v3 = vmul.f32 %v1547_v1, %v1547_v1  ;;  %v1383_v5 = vld [vmem:[%s1853_s5] ss:$12 sps:$4 sm:$0xff]   ;;  %1253 = vmatprep.mubr.msk.bf16.mxu1 %vm1472_vm0, %v1471_v4  ;;  %1245 = vmatprep.mubr.msk.bf16.mxu0 %vm1472_vm0, %v1471_v4  ;;  %v1384_v6 = vld [vmem:[%s1853_s5 + $0x18] ss:$12 sps:$4 sm:$0xff]   ;;  %v1386_v10 = vld [vmem:[%s1853_s5 + $0x48] ss:$12 sps:$4 sm:$0xff]  }
   0x3   :  { %1230 = vmatpush3.bf16.msra.mxu0 %v1383_v5  ;;  %v1389_v8 = vld [vmem:[%s1854_s3] sm:$0xff]   ;;  %v1391_v9 = vld [vmem:[%s1854_s3 + $0x8] sm:$0xff]   ;;  %v1390_v18 = vld [vmem:[%s1853_s5 + $0x90] ss:$12 sps:$4 sm:$0xff]   ;;  %s1483_s23 = smov 126   ;;  %vm1097_vm9 = vcmask 15360  }
   0x4   :  { %126 = vrot.lane.b32.xlu0 %v122_v2, %s1470_s17  ;;  %1231 = vmatprep.subr.bf16.mxu0 %v1471_v4  ;;  %v1583_v11 = vld [vmem:[%s1855_s1] sm:$0xff]  ;;  %v1588_v12 = vld [vmem:[%s1855_s1 + $0x8] sm:$0xff]  ;;  %s1474_s1 = smov 96   ;;  %vm1102_vm10 = vcmask 48128   ;;  %vm1105_vm11 = vcmask 310272  }
   0x5   :  { %1250 = vmatpush3.bf16.msra.mxu1 %v1389_v8  ;;  %v1593_v13 = vpack.c.bf16 %v1588_v12, %v1583_v11  ;;  %v46_v14 = vld [vmem:[%s1856_s4] sm:$0x3]  ;;  %v1388_v17 = vld [vmem:[%s1853_s5 + $0x78] ss:$12 sps:$4 sm:$0xff]   ;;  %v1392_v19 = vld [vmem:[%s1853_s5 + $0xa8] ss:$12 sps:$4 sm:$0xff]  }
   0x6   :  { %1251 = vmatprep.subr.bf16.mxu1 %v1471_v4  ;;  %v1387_v15 = vld [vmem:[%s1853_s5 + $0x60] ss:$12 sps:$4 sm:$0xff]   ;;  %v310_v16 = vsel %vm308_vm1, %v46_v14, 0  ;;  %v1394_v47 = vld [vmem:[%s1853_s5 + $0x4] ss:$12 sps:$4 sm:$0xff]   ;;  %s1478_s4 = smov 64  }
   0x7   :  { %1232 = vmatpush3.bf16.msra.mxu0 %v1384_v6  ;;  %v1393_v20 = vld [vmem:[%s1857_s2] sm:$0xff]   ;;  %s1473_s2 = smov 122   ;;  %v1395_v48 = vld [vmem:[%s1853_s5 + $0x1c] ss:$12 sps:$4 sm:$0xff]   ;;  %v1397_v50 = vld [vmem:[%s1853_s5 + $0x4c] ss:$12 sps:$4 sm:$0xff]  }
   0x8   :  { %128 = vrot.lane.b32.xlu0 %v123_v3, %s1470_s17  ;;  %1233 = vmatprep.subr.bf16.mxu0 %v1471_v4  ;;  %v1396_v49 = vld [vmem:[%s1853_s5 + $0x34] ss:$12 sps:$4 sm:$0xff]   ;;  %v1398_v51 = vld [vmem:[%s1853_s5 + $0x64] ss:$12 sps:$4 sm:$0xff]   ;;  %v1399_v52 = vld [vmem:[%s1853_s5 + $0x7c] ss:$12 sps:$4 sm:$0xff]  }
   0x9   :  { %1252 = vmatpush3.bf16.msra.mxu1 %v1391_v9  ;;  %v1400_v53 = vld [vmem:[%s1853_s5 + $0x94] ss:$12 sps:$4 sm:$0xff]   ;;  %v1401_v54 = vld [vmem:[%s1853_s5 + $0xac] ss:$12 sps:$4 sm:$0xff]  }
   0xa   :  { %1257 = vmatprep.subr.bf16.mxu1 %v1471_v4  ;;  %v1125_v55 = vld [vmem:[%s1858_s8] ss:$0 sm:$0xff] }
   0xb   :  { %1234 = vmatpush3.bf16.msra.mxu0 %v1385_v7 }
   0xc   :  { %1235 = vmatprep.subr.bf16.mxu0 %v1471_v4  ;;  %1254 = vmatmul.mubr.msk.bf16.vlgmr.msra.gmra.mrb[0].mxu1 %vm255_vm2, %v1593_v13 }
   0xd   :  { %1258 = vmatpush3.bf16.msra.mxu1 %v310_v16  ;;  %1259 = vmatprep.mubr.msk.bf16.mxu1 %vm1472_vm0, %v1471_v4 }
   0xe   :  { %1263 = vmatprep.subr.bf16.mxu1 %v1471_v4 }
   0xf   :  { %1236 = vmatpush3.bf16.msra.mxu0 %v1386_v10 }
  0x10   :  { %1237 = vmatprep.subr.bf16.mxu0 %v1471_v4 }
  0x13   :  { %1238 = vmatpush3.bf16.msra.mxu0 %v1387_v15 }
  0x14   :  { %1239 = vmatprep.subr.bf16.mxu0 %v1471_v4 }
  0x17   :  { %1240 = vmatpush3.bf16.msra.mxu0 %v1388_v17  ;;  %v1402_v17 = vld [vmem:[%s1853_s5 + $0x8] ss:$12 sps:$4 sm:$0xff]  }
  0x18   :  { %1241 = vmatprep.subr.bf16.mxu0 %v1471_v4 }
  0x1b   :  { %1242 = vmatpush3.bf16.msra.mxu0 %v1390_v18  ;;  %v1403_v18 = vld [vmem:[%s1853_s5 + $0x20] ss:$12 sps:$4 sm:$0xff]  }
  0x1c   :  { %1243 = vmatprep.subr.bf16.mxu0 %v1471_v4 }
  0x1f   :  { %1244 = vmatpush3.bf16.msra.mxu0 %v1392_v19  ;;  %v1404_v19 = vld [vmem:[%s1853_s5 + $0x38] ss:$12 sps:$4 sm:$0xff]  }
  0x20   :  { %1283 = vmatprep.subr.bf16.mxu0 %v1471_v4 }
  0x22   :  { %1246 = vmatmul.mubr.bf16.vlgmr.msra.gmra.mrb[0].mxu0 %v1393_v20  ;;  %v1405_v20 = vld [vmem:[%s1853_s5 + $0x50] ss:$12 sps:$4 sm:$0xff]  }
  0x23   :  { %1299 = vmatprep.mubr.msk.bf16.mxu0 %vm1472_vm0, %v1471_v4  ;;  %1284 = vmatpush3.bf16.msra.mxu0 %v1402_v17 }
  0x24   :  { %1285 = vmatprep.subr.bf16.mxu0 %v1471_v4 }
  0x27   :  { %1286 = vmatpush3.bf16.msra.mxu0 %v1403_v18 }
  0x28   :  { %1287 = vmatprep.subr.bf16.mxu0 %v1471_v4 }
  0x2b   :  { %1288 = vmatpush3.bf16.msra.mxu0 %v1404_v19 }
  0x2c   :  { %1289 = vmatprep.subr.bf16.mxu0 %v1471_v4 }
  0x2f   :  { %1290 = vmatpush3.bf16.msra.mxu0 %v1405_v20 }
  0x30   :  { %1291 = vmatprep.subr.bf16.mxu0 %v1471_v4 }
  0x76   :  { %v127_v21 = vpop.permute.xlu0 %126 }
  0x77   :  { %v132_v22 = vadd.f32 %v127_v21, %v122_v2  ;;  %v1406_v21 = vld [vmem:[%s1853_s5 + $0x68] ss:$12 sps:$4 sm:$0xff]  }
  0x78   :  { %1292 = vmatpush3.bf16.msra.mxu0 %v1406_v21 }
  0x79   :  { %1420 = vrsqrt.f32 %v132_v22  ;;  %vm136_vm3 = vcmp.eq.f32.partialorder %v132_v22, inf  ;;  %v139_v30 = vand.u32 2147483648, %v132_v22  ;;  %vm138_vm5 = vcmp.eq.f32.partialorder %v132_v22, 0.0  ;;  %1293 = vmatprep.subr.bf16.mxu0 %v1471_v4 }
  0x7a   :  { %v129_v23 = vpop.permute.xlu0 %128 }
  0x7b   :  { %v133_v24 = vadd.f32 %v129_v23, %v123_v3  ;;  %v1408_v23 = vld [vmem:[%s1853_s5 + $0x98] ss:$12 sps:$4 sm:$0xff]  }
  0x7d   :  { %1422 = vrsqrt.f32 %v133_v24  ;;  %vm143_vm4 = vcmp.eq.f32.partialorder %v133_v24, inf  ;;  %v146_v31 = vand.u32 2147483648, %v133_v24  ;;  %vm145_vm6 = vcmp.eq.f32.partialorder %v133_v24, 0.0 }
  0x83   :  { %v1421_v25 = vpop.eup %1420 }
  0x84   :  { %v135_v26 = vmul.f32 %v1421_v25, %v132_v22  ;;  %v1412_v25 = vld [vmem:[%s1860_s6] sm:$0xff]  }
  0x86   :  { %v137_v28 = vsel %vm136_vm3, %v132_v22, %v135_v26  ;;  %v1407_v22 = vld [vmem:[%s1853_s5 + $0x80] ss:$12 sps:$4 sm:$0xff]  }
  0x87   :  { %v1423_v27 = vpop.eup %1422  ;;  %v140_v33 = vsel %vm138_vm5, %v139_v30, %v137_v28  ;;  %1294 = vmatpush3.bf16.msra.mxu0 %v1407_v22  ;;  %v1413_v26 = vld [vmem:[%s1860_s6 + $0x8] sm:$0xff]   ;;  %v1415_v28 = vld [vmem:[%s1860_s6 + $0x18] sm:$0xff]  }
  0x88   :  { %v142_v29 = vmul.f32 %v1423_v27, %v133_v24  ;;  %1295 = vmatprep.subr.bf16.mxu0 %v1471_v4  ;;  %646 = vrot.lane.b32.xlu0 %v1413_v26, %s1474_s1  ;;  %v1414_v27 = vld [vmem:[%s1860_s6 + $0x10] sm:$0xff]   ;;  %v1417_v30 = vld [vmem:[%s1860_s6 + $0x28] sm:$0xff]  }
  0x8a   :  { %v144_v32 = vsel %vm143_vm4, %v133_v24, %v142_v29  ;;  %v1409_v24 = vld [vmem:[%s1853_s5 + $0xb0] ss:$12 sps:$4 sm:$0xff]   ;;  %v1416_v29 = vld [vmem:[%s1860_s6 + $0x20] sm:$0xff]   ;;  %s1479_s5 = smov 32  }
  0x8b   :  { %v147_v34 = vsel %vm145_vm6, %v146_v31, %v144_v32  ;;  %1296 = vmatpush3.bf16.msra.mxu0 %v1408_v23  ;;  %v1418_v31 = vld [vmem:[%s1860_s6 + $0x30] sm:$0xff]   ;;  %v1419_v32 = vld [vmem:[%s1860_s6 + $0x38] sm:$0xff]  }
  0x8c   :  { %v300_v35 = vpack.c.bf16 %v147_v34, %v140_v33  ;;  %1297 = vmatprep.subr.bf16.mxu0 %v1471_v4  ;;  %650 = vrot.lane.b32.xlu0 %v1415_v28, %s1474_s1  ;;  %v1734_v33 = vld [vmem:[%s1859_s7] sm:$0xff]   ;;  %v1739_v34 = vld [vmem:[%s1859_s7 + $0x8] sm:$0xff]   ;;  %s1475_s7 = smov 114  }
  0x8e   :  { %302 = vrot.lane.b32.xlu1 %v300_v35, %s1473_s2  ;;  %v1128_v35 = vld [vmem:[%s1858_s8 + $0x1] ss:$0 sm:$0xff] }
  0x8f   :  { %1298 = vmatpush3.bf16.msra.mxu0 %v1409_v24 }
  0x90   :  { %1323 = vmatprep.subr.bf16.mxu0 %v1471_v4  ;;  %654 = vrot.lane.b32.xlu0 %v1417_v30, %s1474_s1 }
  0x92   :  { %644 = vrot.lane.b32.xlu1 %v1412_v25, %s1474_s1 }
  0x94   :  { %658 = vrot.lane.b32.xlu0 %v1419_v32, %s1474_s1 }
  0x96   :  { %648 = vrot.lane.b32.xlu1 %v1414_v27, %s1474_s1 }
  0x98   :  { %967 = vrot.lane.b32.xlu0 %v1739_v34, %s1474_s1 }
  0x9a   :  { %652 = vrot.lane.b32.xlu1 %v1416_v29, %s1474_s1 }
  0x9c   :  { %713 = vrot.lane.b32.xlu0 %v1547_v1, %s1475_s7 }
  0x9e   :  { %656 = vrot.lane.b32.xlu1 %v1418_v31, %s1474_s1 }
  0xa2   :  { %965 = vrot.lane.b32.xlu1 %v1734_v33, %s1474_s1 }
  0xa6   :  { %711 = vrot.lane.b32.xlu1 %v1542_v0, %s1475_s7 }
  0xdf   :  { %v293_v36 = vpop.f32.mrb[0].mxu1 }
  0xe0   :  { %v1255_v37 = vpop.f32.mrb[1].mxu1 }
  0xe1   :  { %v296_v38 = vpop.f32.mrb[2].mxu1 }
  0xe2   :  { %v1256_v39 = vpop.f32.mrb[3].mxu1 }
  0xf5   :  { %v236_v41 = vpop.f32.mrb[0].mxu0 }
  0xf6   :  { %v294_v42 = vadd.f32 %v293_v36, %v236_v41  ;;  %v1247_v43 = vpop.f32.mrb[1].mxu0 }
  0xf7   :  { %v239_v44 = vpop.f32.mrb[2].mxu0 }
  0xf8   :  { %v297_v45 = vadd.f32 %v296_v38, %v239_v44  ;;  %v1248_v46 = vpop.f32.mrb[3].mxu0 }
 0x100   :  { %v303_v40 = vpop.permute.xlu1 %302 }
 0x101   :  { %1260 = vmatmul.mubr.msk.bf16.vlgmr.msra.gmra.mrb[4].mxu1 %vm304_vm7, %v303_v40 }
 0x102   :  { %1279 = vmatprep.mubr.msk.bf16.mxu1 %vm1472_vm0, %v1471_v4  ;;  %1264 = vmatpush3.bf16.msra.mxu1 %v1394_v47 }
 0x103   :  { %1265 = vmatprep.subr.bf16.mxu1 %v1471_v4 }
 0x106   :  { %1266 = vmatpush3.bf16.msra.mxu1 %v1395_v48 }
 0x107   :  { %1267 = vmatprep.subr.bf16.mxu1 %v1471_v4 }
 0x10a   :  { %1268 = vmatpush3.bf16.msra.mxu1 %v1396_v49 }
 0x10b   :  { %1269 = vmatprep.subr.bf16.mxu1 %v1471_v4 }
 0x10e   :  { %1270 = vmatpush3.bf16.msra.mxu1 %v1397_v50 }
 0x10f   :  { %1271 = vmatprep.subr.bf16.mxu1 %v1471_v4 }
 0x112   :  { %1272 = vmatpush3.bf16.msra.mxu1 %v1398_v51 }
 0x113   :  { %1273 = vmatprep.subr.bf16.mxu1 %v1471_v4 }
 0x116   :  { %1274 = vmatpush3.bf16.msra.mxu1 %v1399_v52 }
 0x117   :  { %1275 = vmatprep.subr.bf16.mxu1 %v1471_v4 }
 0x11a   :  { %1276 = vmatpush3.bf16.msra.mxu1 %v1400_v53  ;;  %v645_v53 = vpop.permute.xlu1 %644 }
 0x11b   :  { %1277 = vmatprep.subr.bf16.mxu1 %v1471_v4 }
 0x11e   :  { %1278 = vmatpush3.bf16.msra.mxu1 %v1401_v54  ;;  %v647_v54 = vpop.permute.xlu0 %646 }
 0x11f   :  { %1303 = vmatprep.subr.bf16.mxu1 %v1471_v4 }
 0x1d4   :  { %v346_v56 = vpop.f32.mrb[4].mxu1 }
 0x1d5   :  { %v353_v57 = vadd.f32 %v346_v56, %v294_v42  ;;  %v1261_v58 = vpop.f32.mrb[5].mxu1  ;;  %v651_v56 = vpop.permute.xlu0 %650 }
 0x1d6   :  { %v349_v59 = vpop.f32.mrb[6].mxu1 }
 0x1d7   :  { %v361_v60 = vadd.f32 %v1125_v55, %v353_v57  ;;  %v354_v61 = vadd.f32 %v349_v59, %v297_v45  ;;  %v1262_v62 = vpop.f32.mrb[7].mxu1 }
 0x1d9   :  { %v1126_v63 = vmul.f32 -1.442695, %v361_v60  ;;  %v362_v2 = vadd.f32 %v1125_v55, %v354_v61  ;;  %v649_v55 = vpop.permute.xlu1 %648  ;;  %v655_v58 = vpop.permute.xlu0 %654  ;;  %v1139_v61 = vld [vmem:[%s1858_s8 + $0x2] ss:$0 sm:$0xff] }
 0x1db   :  { %1424 = vpow2.f32 %v1126_v63  ;;  %v1127_v3 = vmul.f32 -1.442695, %v362_v2 }
 0x1dd   :  { %1426 = vpow2.f32 %v1127_v3  ;;  %v653_v57 = vpop.permute.xlu1 %652 }
 0x1e1   :  { %v657_v59 = vpop.permute.xlu1 %656 }
 0x1e5   :  { %v1425_v5 = vpop.eup %1424 }
 0x1e6   :  { %v369_v6 = vadd.f32 1.0, %v1425_v5 }
 0x1e7   :  { %v1427_v7 = vpop.eup %1426 }
 0x1e8   :  { %1428 = vrcp.f32 %v369_v6  ;;  %v370_v8 = vadd.f32 1.0, %v1427_v7 }
 0x1ea   :  { %1430 = vrcp.f32 %v370_v8 }
 0x1f2   :  { %v1429_v9 = vpop.eup %1428 }
 0x1f3   :  { %v375_v14 = vmul.f32 %v1429_v9, %v361_v60  ;;  %v659_v60 = vpop.permute.xlu0 %658 }
 0x1f4   :  { %v1431_v10 = vpop.eup %1430 }
 0x1f5   :  { %v376_v15 = vmul.f32 %v1431_v10, %v362_v2 }
 0x1f7   :  { %v377_v16 = vpack.c.bf16 %v376_v15, %v375_v14 }
 0x1f9   :  { %1280 = vmatmul.mubr.bf16.vlgmr.msra.gmra.mrb[8].mxu1 %v377_v16 }
 0x1fa   :  { %1319 = vmatprep.mubr.msk.bf16.mxu1 %vm1472_vm0, %v1471_v4  ;;  %1304 = vmatpush3.bf16.msra.mxu1 %v645_v53 }
 0x1fb   :  { %1305 = vmatprep.subr.bf16.mxu1 %v1471_v4 }
 0x1fe   :  { %1306 = vmatpush3.bf16.msra.mxu1 %v647_v54 }
 0x1ff   :  { %1307 = vmatprep.subr.bf16.mxu1 %v1471_v4 }
 0x202   :  { %1308 = vmatpush3.bf16.msra.mxu1 %v649_v55 }
 0x203   :  { %1309 = vmatprep.subr.bf16.mxu1 %v1471_v4 }
 0x206   :  { %1310 = vmatpush3.bf16.msra.mxu1 %v651_v56 }
 0x207   :  { %1311 = vmatprep.subr.bf16.mxu1 %v1471_v4 }
 0x20a   :  { %1312 = vmatpush3.bf16.msra.mxu1 %v653_v57 }
 0x20b   :  { %1313 = vmatprep.subr.bf16.mxu1 %v1471_v4 }
 0x20e   :  { %1314 = vmatpush3.bf16.msra.mxu1 %v655_v58 }
 0x20f   :  { %1315 = vmatprep.subr.bf16.mxu1 %v1471_v4 }
 0x212   :  { %1316 = vmatpush3.bf16.msra.mxu1 %v657_v59 }
 0x213   :  { %1317 = vmatprep.subr.bf16.mxu1 %v1471_v4 }
 0x216   :  { %1318 = vmatpush3.bf16.msra.mxu1 %v659_v60 }
 0x217   :  { %1351 = vmatprep.subr.bf16.mxu1 %v1471_v4 }
 0x2cc   :  { %v466_v36 = vpop.f32.mrb[8].mxu1 }
 0x2cd   :  { %v467_v37 = vadd.f32 %v1128_v35, %v466_v36  ;;  %v1281_v38 = vpop.f32.mrb[9].mxu1 }
 0x2ce   :  { %v469_v39 = vpop.f32.mrb[10].mxu1 }
 0x2cf   :  { %v1137_v40 = vmul.f32 -1.442695, %v467_v37  ;;  %v470_v41 = vadd.f32 %v1128_v35, %v469_v39  ;;  %v1282_v42 = vpop.f32.mrb[11].mxu1 }
 0x2d1   :  { %1432 = vpow2.f32 %v1137_v40  ;;  %v1138_v43 = vmul.f32 -1.442695, %v470_v41 }
 0x2d3   :  { %1434 = vpow2.f32 %v1138_v43 }
 0x2db   :  { %v1433_v44 = vpop.eup %1432 }
 0x2dc   :  { %v479_v45 = vadd.f32 1.0, %v1433_v44 }
 0x2dd   :  { %v1435_v46 = vpop.eup %1434 }
 0x2de   :  { %1436 = vrcp.f32 %v479_v45  ;;  %v480_v47 = vadd.f32 1.0, %v1435_v46  ;;  %v1800_v46 = vld [vmem:[%s1861_s9] ss:$0 sm:$0xff] }
 0x2e0   :  { %1438 = vrcp.f32 %v480_v47 }
 0x2e8   :  { %v1437_v48 = vpop.eup %1436 }
 0x2e9   :  { %v485_v50 = vmul.f32 %v1437_v48, %v467_v37 }
 0x2ea   :  { %v1439_v49 = vpop.eup %1438 }
 0x2eb   :  { %v486_v51 = vmul.f32 %v1439_v49, %v470_v41 }
 0x2ed   :  { %v487_v52 = vpack.c.bf16 %v486_v51, %v485_v50 }
 0x2ef   :  { %1300 = vmatmul.mubr.bf16.vlgmr.msra.gmra.mrb[4].mxu0 %v487_v52 }
 0x2f0   :  { %1324 = vmatpush3.bf16.msra.mxu0 %v1734_v33  ;;  %1327 = vmatprep.mubr.msk.bf16.mxu0 %vm1472_vm0, %v1471_v4 }
 0x2f1   :  { %1325 = vmatprep.subr.bf16.mxu0 %v1471_v4 }
 0x2f4   :  { %1326 = vmatpush3.bf16.msra.mxu0 %v1739_v34 }
 0x2f5   :  { %1331 = vmatprep.subr.bf16.mxu0 %v1471_v4 }
 0x2f7   :  { %1328 = vmatmul.mubr.msk.bf16.vlgmr.msra.gmra.mrb[8].mxu0 %vm255_vm2, %v1593_v13 }
 0x2f8   :  { %1332 = vmatpush3.bf16.msra.mxu0 %v1412_v25  ;;  %1347 = vmatprep.mubr.msk.bf16.mxu0 %vm1472_vm0, %v1471_v4  ;;  %v966_v25 = vpop.permute.xlu1 %965 }
 0x2f9   :  { %1333 = vmatprep.subr.bf16.mxu0 %v1471_v4 }
 0x2fc   :  { %1334 = vmatpush3.bf16.msra.mxu0 %v1413_v26  ;;  %v968_v26 = vpop.permute.xlu0 %967  ;;  %v1789_v35 = vpop.permute.xlu1 %711 }
 0x2fd   :  { %1335 = vmatprep.subr.bf16.mxu0 %v1471_v4 }
 0x300   :  { %1336 = vmatpush3.bf16.msra.mxu0 %v1414_v27  ;;  %v1791_v39 = vpop.permute.xlu0 %713 }
 0x301   :  { %1337 = vmatprep.subr.bf16.mxu0 %v1471_v4 }
 0x304   :  { %1338 = vmatpush3.bf16.msra.mxu0 %v1415_v28 }
 0x305   :  { %1339 = vmatprep.subr.bf16.mxu0 %v1471_v4 }
 0x308   :  { %1340 = vmatpush3.bf16.msra.mxu0 %v1416_v29 }
 0x309   :  { %1341 = vmatprep.subr.bf16.mxu0 %v1471_v4 }
 0x30c   :  { %1342 = vmatpush3.bf16.msra.mxu0 %v1417_v30 }
 0x30d   :  { %1343 = vmatprep.subr.bf16.mxu0 %v1471_v4 }
 0x310   :  { %1344 = vmatpush3.bf16.msra.mxu0 %v1418_v31  ;;  %v1150_v31 = vld [vmem:[%s1858_s8 + $0x3] ss:$0 sm:$0xff]  ;;  %s1477_s8 = smov 10  }
 0x311   :  { %1345 = vmatprep.subr.bf16.mxu0 %v1471_v4 }
 0x314   :  { %1346 = vmatpush3.bf16.msra.mxu0 %v1419_v32 }
 0x317   :  { %1348 = vmatmul.mubr.bf16.vlgmr.msra.gmra.mrb[12].mxu0 %v487_v52 }
 0x3c2   :  { %v576_v62 = vpop.f32.mrb[4].mxu0 }
 0x3c3   :  { %v577_v63 = vadd.f32 %v1139_v61, %v576_v62  ;;  %v1301_v2 = vpop.f32.mrb[5].mxu0 }
 0x3c4   :  { %v579_v3 = vpop.f32.mrb[6].mxu0 }
 0x3c5   :  { %v1148_v5 = vmul.f32 -1.442695, %v577_v63  ;;  %v580_v6 = vadd.f32 %v1139_v61, %v579_v3  ;;  %v1302_v7 = vpop.f32.mrb[7].mxu0 }
 0x3c7   :  { %1440 = vpow2.f32 %v1148_v5  ;;  %v1149_v8 = vmul.f32 -1.442695, %v580_v6 }
 0x3c9   :  { %1442 = vpow2.f32 %v1149_v8 }
 0x3ca   :  { %v831_v9 = vpop.f32.mrb[8].mxu0 }
 0x3cb   :  { %v1329_v10 = vpop.f32.mrb[9].mxu0  ;;  %v832_v50 = vadd.f32 %v1800_v46, %v831_v9 }
 0x3cc   :  { %v834_v14 = vpop.f32.mrb[10].mxu0 }
 0x3cd   :  { %v1330_v15 = vpop.f32.mrb[11].mxu0  ;;  %v835_v51 = vadd.f32 %v1800_v46, %v834_v14  ;;  %v1163_v52 = vmul.f32 -1.442695, %v832_v50 }
 0x3cf   :  { %v1164_v55 = vmul.f32 -1.442695, %v835_v51 }
 0x3d1   :  { %v1441_v16 = vpop.eup %1440 }
 0x3d2   :  { %v589_v17 = vadd.f32 1.0, %v1441_v16 }
 0x3d3   :  { %v1443_v18 = vpop.eup %1442 }
 0x3d4   :  { %1444 = vrcp.f32 %v589_v17  ;;  %v590_v19 = vadd.f32 1.0, %v1443_v18 }
 0x3d6   :  { %1446 = vrcp.f32 %v590_v19 }
 0x3d7   :  { %1448 = vpow2.f32 %v1163_v52 }
 0x3d8   :  { %1450 = vpow2.f32 %v1164_v55 }
 0x3de   :  { %v1445_v20 = vpop.eup %1444 }
 0x3df   :  { %v595_v22 = vmul.f32 %v1445_v20, %v577_v63 }
 0x3e0   :  { %v1447_v21 = vpop.eup %1446 }
 0x3e1   :  { %v596_v23 = vmul.f32 %v1447_v21, %v580_v6 }
 0x3e3   :  { %v597_v24 = vpack.c.bf16 %v596_v23, %v595_v22 }
 0x3e5   :  { %1320 = vmatmul.mubr.bf16.vlgmr.msra.gmra.mrb[12].mxu1 %v597_v24  ;;  %v722_v24 = vsel %vm304_vm7, %v1791_v39, 0.0 }
 0x3e6   :  { %1352 = vmatpush3.bf16.msra.mxu1 %v966_v25  ;;  %1355 = vmatprep.mubr.msk.bf16.mxu1 %vm1472_vm0, %v1471_v4 }
 0x3e7   :  { %1353 = vmatprep.subr.bf16.mxu1 %v1471_v4 }
 0x3ea   :  { %v958_v27 = vpop.f32.mrb[12].mxu0  ;;  %1354 = vmatpush3.bf16.msra.mxu1 %v968_v26 }
 0x3eb   :  { %v1349_v28 = vpop.f32.mrb[13].mxu0  ;;  %1359 = vmatprep.subr.bf16.mxu1 %v1471_v4 }
 0x3ec   :  { %v961_v29 = vpop.f32.mrb[14].mxu0  ;;  %v719_v28 = vsel %vm304_vm7, %v1789_v35, 0.0 }
 0x3ed   :  { %v1350_v30 = vpop.f32.mrb[15].mxu0  ;;  %1356 = vmatmul.mubr.msk.bf16.vlgmr.msra.gmra.mrb[16].mxu1 %vm255_vm2, %v1593_v13 }
 0x3ee   :  { %1363 = vmatprep.mubr.msk.bf16.mxu1 %vm1472_vm0, %v1471_v4  ;;  %v1481_v30 = vmov 0  }
 0x3ef   :  { %1382 = vset.pattern.permute.xlu1 %v1481_v30  ;;  %1381 = vset.pattern.permute.xlu0 %v1481_v30 }
 0x4b8   :  { %v702_v32 = vpop.f32.mrb[12].mxu1 }
 0x4b9   :  { %v703_v36 = vadd.f32 %v1150_v31, %v702_v32  ;;  %v1321_v37 = vpop.f32.mrb[13].mxu1 }
 0x4ba   :  { %v705_v38 = vpop.f32.mrb[14].mxu1 }
 0x4bb   :  { %v717_v40 = vmul.f32 %v1789_v35, %v703_v36  ;;  %v706_v41 = vadd.f32 %v1150_v31, %v705_v38  ;;  %v1322_v42 = vpop.f32.mrb[15].mxu1 }
 0x4bc   :  { %v1165_v42 = vld [vmem:[%s1861_s9 + $0x1] ss:$0 sm:$0xff]  ;;  %s1482_s9 = smov 4  }
 0x4bd   :  { %v718_v13 = vmul.f32 %v1791_v39, %v706_v41  ;;  %731 = vrot.lane.b32.xlu1 %v717_v40, %s1476_s15 }
 0x4bf   :  { %733 = vrot.lane.b32.xlu0 %v718_v13, %s1476_s15 }
 0x4c0   :  { %v1005_v43 = vpop.f32.mrb[16].mxu1 }
 0x4c1   :  { %v1006_v44 = vadd.f32 %v1005_v43, %v958_v27  ;;  %755 = vrot.lane.b32.xlu1 %v717_v40, %s1477_s8  ;;  %v1357_v45 = vpop.f32.mrb[17].mxu1 }
 0x4c2   :  { %v1008_v47 = vpop.f32.mrb[18].mxu1 }
 0x4c3   :  { %v1009_v48 = vadd.f32 %v1008_v47, %v961_v29  ;;  %757 = vrot.lane.b32.xlu0 %v718_v13, %s1477_s8  ;;  %v1358_v49 = vpop.f32.mrb[19].mxu1 }
 0x4c5   :  { %1012 = vrot.lane.b32.xlu1 %v1800_v46, %s1474_s1  ;;  %s1480_s1 = smov 118  }
 0x4c7   :  { %1032 = vrot.lane.b32.xlu0 %v1734_v33, %s1478_s4 }
 0x4c9   :  { %1034 = vrot.lane.b32.xlu1 %v1739_v34, %s1478_s4 }
 0x4cb   :  { %852 = vrot.lane.b32.xlu0 %v1800_v46, %s1479_s5 }
 0x52f   :  { %v732_v53 = vpop.permute.xlu1 %731 }
 0x530   :  { %v737_v54 = vmul.f32 %v732_v53, %v1542_v0 }
 0x531   :  { %v734_v56 = vpop.permute.xlu0 %733 }
 0x532   :  { %v738_v57 = vmul.f32 %v734_v56, %v1547_v1  ;;  %741 = vrot.lane.b32.xlu1 %v737_v54, %s1473_s2 }
 0x533   :  { %v756_v33 = vpop.permute.xlu1 %755 }
 0x534   :  { %v761_v34 = vmul.f32 %v756_v33, %v1542_v0  ;;  %743 = vrot.lane.b32.xlu0 %v738_v57, %s1473_s2  ;;  %v1449_v0 = vpop.eup %1448 }
 0x535   :  { %v758_v58 = vpop.permute.xlu0 %757  ;;  %v1451_v6 = vpop.eup %1450  ;;  %v844_v7 = vadd.f32 1.0, %v1449_v0 }
 0x536   :  { %v762_v59 = vmul.f32 %v758_v58, %v1547_v1  ;;  %765 = vrot.lane.b32.xlu1 %v761_v34, %s1480_s1  ;;  %v845_v1 = vadd.f32 1.0, %v1451_v6 }
 0x537   :  { %v1013_v60 = vpop.permute.xlu1 %1012 }
 0x538   :  { %v1015_v61 = vadd.f32 %v1013_v60, %v1006_v44  ;;  %v1016_v62 = vadd.f32 %v1013_v60, %v1009_v48  ;;  %767 = vrot.lane.b32.xlu0 %v762_v59, %s1480_s1 }
 0x539   :  { %v1033_v63 = vpop.permute.xlu0 %1032 }
 0x53a   :  { %v1167_v2 = vmul.f32 -1.442695, %v1015_v61  ;;  %v1168_v3 = vmul.f32 -1.442695, %v1016_v62  ;;  %1360 = vmatpush3.bf16.msra.mxu1 %v1033_v63 }
 0x53b   :  { %v1035_v5 = vpop.permute.xlu1 %1034  ;;  %1361 = vmatprep.subr.bf16.mxu1 %v1471_v4 }
 0x53c   :  { %1452 = vpow2.f32 %v1167_v2 }
 0x53d   :  { %1454 = vpow2.f32 %v1168_v3  ;;  %v853_v18 = vpop.permute.xlu0 %852 }
 0x53e   :  { %1362 = vmatpush3.bf16.msra.mxu1 %v1035_v5  ;;  %1456 = vrcp.f32 %v844_v7  ;;  %v1468_v5 = vld [vmem:[%s1852_s0] sm:$0xff] }
 0x53f   :  { %1458 = vrcp.f32 %v845_v1  ;;  %v1469_v1 = vld [vmem:[%s1852_s0 + $0x8] sm:$0xff] }
 0x546   :  { %v1453_v8 = vpop.eup %1452 }
 0x547   :  { %v1455_v9 = vpop.eup %1454  ;;  %v1023_v10 = vadd.f32 1.0, %v1453_v8 }
 0x548   :  { %v1024_v14 = vadd.f32 1.0, %v1455_v9  ;;  %v1457_v15 = vpop.eup %1456 }
 0x549   :  { %1460 = vrcp.f32 %v1023_v10  ;;  %v1459_v16 = vpop.eup %1458  ;;  %v850_v17 = vmul.f32 %v1457_v15, %v832_v50 }
 0x54a   :  { %1462 = vrcp.f32 %v1024_v14  ;;  %v851_v19 = vmul.f32 %v1459_v16, %v835_v51 }
 0x54b   :  { %v855_v22 = vmul.f32 %v853_v18, %v850_v17 }
 0x54c   :  { %v856_v26 = vmul.f32 %v853_v18, %v851_v19 }
 0x54d   :  { %v857_v27 = vsel %vm255_vm2, %v855_v22, 0.0 }
 0x54e   :  { %v860_v29 = vsel %vm255_vm2, %v856_v26, 0.0 }
 0x553   :  { %v1461_v4 = vpop.eup %1460 }
 0x554   :  { %v1463_v20 = vpop.eup %1462  ;;  %v1029_v21 = vmul.f32 %v1461_v4, %v1015_v61 }
 0x555   :  { %v1030_v23 = vmul.f32 %v1463_v20, %v1016_v62 }
 0x557   :  { %v1031_v25 = vpack.c.bf16 %v1030_v23, %v1029_v21  ;;  %723 = vadd.xlane.f32.xlu0 %v722_v24 }
 0x559   :  { %1364 = vmatmul.mubr.msk.bf16.vlgmr.msra.gmra.mrb[20].mxu1 %vm255_vm2, %v1031_v25 }
 0x55a   :  { %720 = vadd.xlane.f32.xlu1 %v719_v28 }
 0x55b   :  { %858 = vadd.xlane.f32.xlu0 %v857_v27 }
 0x55e   :  { %861 = vadd.xlane.f32.xlu1 %v860_v29 }
 0x5a4   :  { %v742_v31 = vpop.permute.xlu1 %741 }
 0x5a5   :  { %v747_v32 = vsel %vm304_vm7, %v742_v31, 0.0 }
 0x5a6   :  { %v744_v36 = vpop.permute.xlu0 %743  ;;  %748 = vadd.xlane.f32.xlu0 %v747_v32 }
 0x5a7   :  { %v750_v37 = vsel %vm304_vm7, %v744_v36, 0.0 }
 0x5a8   :  { %v766_v38 = vpop.permute.xlu1 %765  ;;  %751 = vadd.xlane.f32.xlu1 %v750_v37 }
 0x5a9   :  { %v771_v39 = vsel %vm304_vm7, %v766_v38, 0.0 }
 0x5aa   :  { %v768_v35 = vpop.permute.xlu0 %767  ;;  %772 = vadd.xlane.f32.xlu0 %v771_v39 }
 0x5ab   :  { %v774_v40 = vsel %vm304_vm7, %v768_v35, 0.0 }
 0x5ac   :  { %775 = vadd.xlane.f32.xlu1 %v774_v40 }
 0x5e4   :  { %v724_v41 = vpop.xlane.xlu0 %723 }
 0x5e5   :  { %v726_v49 = vadd.f32 1e-06, %v724_v41 }
 0x5e7   :  { %v721_v13 = vpop.xlane.xlu1 %720 }
 0x5e8   :  { %v859_v43 = vpop.xlane.xlu0 %858  ;;  %v725_v48 = vadd.f32 1e-06, %v721_v13 }
 0x5e9   :  { %v869_v44 = vadd.f32 %v1165_v42, %v859_v43 }
 0x5ea   :  { %1464 = vrcp.f32 %v725_v48 }
 0x5eb   :  { %v862_v45 = vpop.xlane.xlu1 %861  ;;  %873 = vperm.xlu0 %1381, %v869_v44   ;;  %1466 = vrcp.f32 %v726_v49 }
 0x5ec   :  { %v870_v47 = vadd.f32 %v1165_v42, %v862_v45 }
 0x5ee   :  { %878 = vperm.xlu1 %1382, %v870_v47  }
 0x5f4   :  { %v1465_v56 = vpop.eup %1464 }
 0x5f5   :  { %v1467_v58 = vpop.eup %1466 }
 0x62c   :  { %v1075_v50 = vpop.f32.mrb[20].mxu1 }
 0x62d   :  { %v1365_v51 = vpop.f32.mrb[21].mxu1  ;;  %v1082_v18 = vadd.f32 %v1075_v50, %v1583_v11 }
 0x62e   :  { %v1078_v52 = vpop.f32.mrb[22].mxu1 }
 0x62f   :  { %v1366_v53 = vpop.f32.mrb[23].mxu1  ;;  %v1083_v4 = vadd.f32 %v1078_v52, %v1588_v12 }
 0x633   :  { %v749_v54 = vpop.xlane.xlu0 %748 }
 0x634   :  { %v753_v33 = vmul.f32 %v1465_v56, %v749_v54 }
 0x635   :  { %v752_v55 = vpop.xlane.xlu1 %751 }
 0x636   :  { %v754_v62 = vmul.f32 %v1467_v58, %v752_v55 }
 0x637   :  { %v773_v57 = vpop.xlane.xlu0 %772 }
 0x638   :  { %v777_v34 = vmul.f32 %v1465_v56, %v773_v57 }
 0x639   :  { %v776_v59 = vpop.xlane.xlu1 %775 }
 0x63a   :  { %v778_v60 = vmul.f32 %v1467_v58, %v776_v59  ;;  %v884_v61 = vsel %vm883_vm8, %v753_v33, %v777_v34 }
 0x63b   :  { %888 = vrot.lane.b32.xlu1 %v884_v61, %s1482_s9 }
 0x63c   :  { %v885_v63 = vsel %vm883_vm8, %v754_v62, %v778_v60 }
 0x63f   :  { %890 = vrot.lane.b32.xlu1 %v885_v63, %s1482_s9 }
 0x66a   :  { %v874_v3 = vpop.permute.xlu0 %873 }
 0x66b   :  { %v881_v0 = vmul.f32 %v1468_v5, %v874_v3 }
 0x66d   :  { %v879_v2 = vpop.permute.xlu1 %878 }
 0x66e   :  { %v882_v8 = vmul.f32 %v1469_v1, %v879_v2 }
 0x6ad   :  { %v889_v6 = vpop.permute.xlu1 %888 }
 0x6ae   :  { %v894_v7 = vadd.f32 %v889_v6, %v881_v0 }
 0x6b0   :  { %898 = vrot.lane.b32.xlu1 %v894_v7, %s1483_s23 }
 0x6b1   :  { %v891_v9 = vpop.permute.xlu1 %890 }
 0x6b2   :  { %v895_v10 = vadd.f32 %v891_v9, %v882_v8 }
 0x6b4   :  { %900 = vrot.lane.b32.xlu1 %v895_v10, %s1483_s23 }
 0x6b8   :  { %1084 = vrot.lane.b32.xlu1 %v1800_v46, %s1478_s4 }
 0x722   :  { %v899_v14 = vpop.permute.xlu1 %898 }
 0x723   :  { %v904_v15 = vadd.f32 %v1468_v5, %v899_v14 }
 0x725   :  { %908 = vrot.lane.b32.xlu1 %v904_v15, %s1483_s23 }
 0x726   :  { %v901_v16 = vpop.permute.xlu1 %900 }
 0x727   :  { %v905_v17 = vadd.f32 %v1469_v1, %v901_v16 }
 0x729   :  { %910 = vrot.lane.b32.xlu1 %v905_v17, %s1483_s23 }
 0x72a   :  { %v1085_v19 = vpop.permute.xlu1 %1084 }
 0x72b   :  { %v1087_v20 = vadd.f32 %v1085_v19, %v1082_v18  ;;  %v1088_v21 = vadd.f32 %v1085_v19, %v1083_v4 }
 0x72d   :  { %1093 = vrot.lane.b32.xlu1 %v1088_v21, %s1476_s15  ;;  %1091 = vrot.lane.b32.xlu0 %v1087_v20, %s1476_s15 }
 0x797   :  { %v909_v22 = vpop.permute.xlu1 %908 }
 0x798   :  { %v914_v23 = vadd.f32 %v1468_v5, %v909_v22 }
 0x79a   :  { %v1098_v24 = vsel %vm1097_vm9, %v914_v23, %v904_v15 }
 0x79b   :  { %v911_v46 = vpop.permute.xlu1 %910  ;;  %v1100_v12 = vsel %vm304_vm7, %v1098_v24, %v894_v7 }
 0x79c   :  { %v915_v25 = vadd.f32 %v1469_v1, %v911_v46 }
 0x79e   :  { %v1099_v26 = vsel %vm1097_vm9, %v915_v25, %v905_v17 }
 0x79f   :  { %v1092_v11 = vpop.permute.xlu0 %1091  ;;  %v1101_v27 = vsel %vm304_vm7, %v1099_v26, %v895_v10  ;;  %v1094_v28 = vpop.permute.xlu1 %1093 }
 0x7a0   :  { %v1103_v29 = vsel %vm1102_vm10, %v1100_v12, %v1092_v11  ;;  %v1104_v30 = vsel %vm1102_vm10, %v1101_v27, %v1094_v28 }
 0x7a1   :  { %1106 = vst.msk [vmem:[%s1862_s10] sm:$0xff] %vm1105_vm11, %v1103_v29  ;;  %1107 = vst.msk [vmem:[%s1862_s10 + $0x8] sm:$0xff] %vm1105_vm11, %v1104_v30 }

</bundles_post_ra>
